<compile_context>
chip_gen: v7x
topology: tpu7x:2x2x1
jax: 0.10.0
libtpu: 0.0.40
codegen_flags: <defaults>
</compile_context>

<pallas_src>
import jax
import jax.numpy as jnp
from jax.experimental import pallas as pl
from jax.experimental.pallas import tpu as pltpu

HIDDEN = 50
GATE_PAD = 128          # one 128-lane block per gate
NGATES = 4
GF = NGATES * GATE_PAD  # 512: padded gate width of one direction


def _round_up(x, m):
    return (x + m - 1) // m * m


def _sigmoid(x):
    # sigmoid(x) == 0.5 * (1 + tanh(0.5 * x)): one EUP op instead of exp + reciprocal.
    return 0.5 * (jnp.tanh(0.5 * x) + 1.0)


def bilstm_kernel(
    x_ref,        # (Tc, BT, D)   time-major input chunk
    wih_f_ref,    # (D, GF)       forward W_ih^T, lane-padded
    wih_b_ref,    # (D, GF)       backward W_ih^T, lane-padded (used only at t=T-1)
    b_f_ref,      # (1, GF)       forward (b_ih + b_hh), f32
    b_b_ref,      # (1, GF)       backward (b_ih + b_hh), f32
    whh_f_ref,    # (GATE_PAD, GF) forward W_hh^T, lane-padded, rows >= H are zero
    fcw_f_ref,    # (1, GATE_PAD) fc weight, forward half, zero-padded
    fcw_b_ref,    # (1, GATE_PAD) fc weight, backward half, zero-padded
    fcb_ref,      # (1, 1)
    out_ref,      # (BT, 1)
    xg_ref,       # scratch (Tc, BT, GF) f32: forward-gate pre-activations (this chunk)
    h_ref,        # scratch (BT, GATE_PAD) f32: forward hidden state carried across chunks
    c_ref,        # scratch (BT, GATE_PAD) f32: forward cell state carried across chunks
):
    Tc, BT, D = x_ref.shape
    t_idx = pl.program_id(1)
    n_tc = pl.num_programs(1)

    @pl.when(t_idx == 0)
    def _():
        h_ref[...] = jnp.zeros_like(h_ref)
        c_ref[...] = jnp.zeros_like(c_ref)

    # ---- forward-gate projection for THIS chunk only (backward gates are not part
    # of the bulk matmul anymore: they are only needed at t = T-1). Bias folded once.
    x_flat = x_ref[...].reshape(Tc * BT, D)
    xg = jnp.dot(x_flat, wih_f_ref[...], preferred_element_type=jnp.float32)
    xg_ref[...] = (xg + b_f_ref[...]).reshape(Tc, BT, GF)

    # ---- forward recurrence over this chunk; h/c carried in VMEM across chunks ----
    def fwd_step(t, carry):
        h, c = carry
        # whh_f_ref is read inside the loop (a hoisted (128,512) f32 value would be
        # 64 vregs == the whole register file -> spill churn in the unrolled body).
        gates = xg_ref[t] + jnp.dot(
            h.astype(whh_f_ref.dtype), whh_f_ref[...],
            preferred_element_type=jnp.float32,
        )
        i = _sigmoid(gates[:, 0 * GATE_PAD:1 * GATE_PAD])
        f = _sigmoid(gates[:, 1 * GATE_PAD:2 * GATE_PAD])
        g = jnp.tanh(gates[:, 2 * GATE_PAD:3 * GATE_PAD])
        o = _sigmoid(gates[:, 3 * GATE_PAD:4 * GATE_PAD])
        c_new = f * c + i * g
        h_new = o * jnp.tanh(c_new)                 # padded lanes stay exactly 0
        return h_new, c_new

    unroll = True if Tc <= 16 else 4
    h_new, c_new = jax.lax.fori_loop(
        0, Tc, fwd_step, (h_ref[...], c_ref[...]), unroll=unroll)
    h_ref[...] = h_new
    c_ref[...] = c_new

    @pl.when(t_idx == n_tc - 1)
    def _():
        # ---- reverse direction: exactly one cell step from zero state on x[T-1].
        # h0 == 0 so W_hh_b contributes nothing; c0 == 0 so the forget gate is moot.
        gb = jnp.dot(x_ref[Tc - 1], wih_b_ref[...],
                     preferred_element_type=jnp.float32) + b_b_ref[...]
        i_b = _sigmoid(gb[:, 0 * GATE_PAD:1 * GATE_PAD])
        g_b = jnp.tanh(gb[:, 2 * GATE_PAD:3 * GATE_PAD])
        o_b = _sigmoid(gb[:, 3 * GATE_PAD:4 * GATE_PAD])
        h_bwd = o_b * jnp.tanh(i_b * g_b)           # (BT, 128), padded lanes exactly 0

        # ---- fc head: padded lanes of h and of the fc weights are exactly zero, so
        # a VPU multiply + lane reduce is exact (no concat, no 100x1 MXU matmul).
        out = (
            jnp.sum(h_new * fcw_f_ref[...], axis=-1, keepdims=True)
            + jnp.sum(h_bwd * fcw_b_ref[...], axis=-1, keepdims=True)
            + fcb_ref[...]
        )
        out_ref[...] = out.astype(out_ref.dtype)


# ----------------------------- host-side packing -----------------------------

def _pad_gate_cols(w, H):
    """(K, 4H) -> (K, 4*GATE_PAD): gate k placed at columns [k*128, k*128 + H)."""
    K = w.shape[0]
    out = jnp.zeros((K, NGATES * GATE_PAD), w.dtype)
    for k in range(NGATES):
        out = out.at[:, k * GATE_PAD:k * GATE_PAD + H].set(w[:, k * H:(k + 1) * H])
    return out


def pack_params(params, hidden=HIDDEN, dtype=jnp.float32):
    """PyTorch-layout params -> pre-transposed, lane-padded kernel params.

    dtype=jnp.bfloat16 runs the matmul operands in bf16 (f32 accumulation) — halves
    weight/x bytes and guarantees single-pass MXU issue on v6e/v7x, but deviates from
    fp32 PyTorch beyond ~2e-5, so it is off by default (biases / fc stay f32 always).
    """
    H = hidden
    wih_f = _pad_gate_cols(params["wih_f"].T, H).astype(dtype)      # (D, 512)
    wih_b = _pad_gate_cols(params["wih_b"].T, H).astype(dtype)      # (D, 512)
    b_f = _pad_gate_cols(params["b_f"], H).astype(jnp.float32)      # (1, 512)
    b_b = _pad_gate_cols(params["b_b"], H).astype(jnp.float32)      # (1, 512)

    whh_f_t = _pad_gate_cols(params["whh_f"].T, H)                  # (H, 512)
    whh_f = (
        jnp.zeros((GATE_PAD, GF), jnp.float32).at[:H].set(whh_f_t).astype(dtype)
    )
    # NOTE: W_hh of the reverse direction never influences lstm_out[:, -1, :]
    # (the reverse LSTM starts from zero state at t = T-1), so it is not packed.

    fcw_f = jnp.zeros((1, GATE_PAD), jnp.float32).at[:, :H].set(params["fc_w"][:, :H])
    fcw_b = jnp.zeros((1, GATE_PAD), jnp.float32).at[:, :H].set(params["fc_w"][:, H:])

    return dict(
        wih_f=wih_f, wih_b=wih_b, b_f=b_f, b_b=b_b, whh_f=whh_f,
        fcw_f=fcw_f, fcw_b=fcw_b, fc_b=params["fc_b"].astype(jnp.float32),
    )


# ----------------------------- tiling heuristics -----------------------------

def _vmem_limit_bytes():
    # Leave ~15% headroom for compiler/internal scratch rather than hard-coding
    # the full physical size (64 MiB/TC on v7x, 128 MiB on v5e/v6e).
    try:
        cap = pltpu.get_tpu_info().vmem_capacity_bytes
    except Exception:
        cap = 64 * 1024 * 1024
    return int(cap * 0.85)


def _default_batch_tile(B):
    # v6e/v7x MXUs are 2x256x256: BT=256 fills the systolic rows and halves grid
    # steps when the batch allows.  v5e's 4x128x128 MXU is already full at BT=128.
    kind = ""
    try:
        kind = jax.devices()[0].device_kind.lower()
    except Exception:
        pass
    big_mxu = bool(kind) and ("v5" not in kind) and ("v4" not in kind) and ("v3" not in kind)
    if big_mxu and B >= 256:
        return 256
    if B >= 128:
        return 128
    return _round_up(max(B, 8), 8)


def _choose_time_chunk(T, BT):
    # Bound the (Tc, BT, GF) f32 gate scratch (the dominant T-scaling buffer) to
    # ~8 MiB so VMEM stays bounded for large T.  No time padding is allowed (extra
    # zero-input steps would change the recurrence), so pick the largest divisor of T.
    budget = 8 * 1024 * 1024
    target = max(1, budget // (BT * GF * 4))
    best = 1
    for d in range(1, T + 1):
        if T % d == 0 and d <= target:
            best = d
    return best


# ----------------------------- wrapper -----------------------------

def bilstm_forward(x, kp, *, batch_tile=None, time_chunk=None):
    """x: (B, T, D) batch-first. Returns (B, 1) fp32 == fc(lstm_out[:, -1, :])."""
    B, T, D = x.shape
    if batch_tile is None:
        batch_tile = _default_batch_tile(B)
    BT = batch_tile
    B_pad = _round_up(max(B, BT), BT)
    if time_chunk is None:
        time_chunk = _choose_time_chunk(T, BT)
    Tc = time_chunk
    assert T % Tc == 0, (T, Tc)

    x = x.astype(kp["wih_f"].dtype)
    if B_pad != B:
        x = jnp.pad(x, ((0, B_pad - B), (0, 0), (0, 0)))
    x_tbd = jnp.transpose(x, (1, 0, 2))                      # (T, B_pad, D) time-major

    w_map = lambda b, t: (0, 0)
    out = pl.pallas_call(
        bilstm_kernel,
        out_shape=jax.ShapeDtypeStruct((B_pad, 1), jnp.float32),
        grid_spec=pltpu.PrefetchScalarGridSpec(
            num_scalar_prefetch=0,
            grid=(B_pad // BT, T // Tc),                     # (batch tiles, time chunks)
            in_specs=[
                pl.BlockSpec((Tc, BT, D), lambda b, t: (t, b, 0)),
                pl.BlockSpec((D, GF), w_map),
                pl.BlockSpec((D, GF), w_map),
                pl.BlockSpec((1, GF), w_map),
                pl.BlockSpec((1, GF), w_map),
                pl.BlockSpec((GATE_PAD, GF), w_map),
                pl.BlockSpec((1, GATE_PAD), w_map),
                pl.BlockSpec((1, GATE_PAD), w_map),
                pl.BlockSpec((1, 1), w_map),
            ],
            out_specs=pl.BlockSpec((BT, 1), lambda b, t: (b, 0)),
            scratch_shapes=[
                pltpu.VMEM((Tc, BT, GF), jnp.float32),       # per-chunk gate scratch
                pltpu.VMEM((BT, GATE_PAD), jnp.float32),     # h carried across chunks
                pltpu.VMEM((BT, GATE_PAD), jnp.float32),     # c carried across chunks
            ],
        ),
        compiler_params=pltpu.CompilerParams(
            dimension_semantics=("parallel", "arbitrary"),   # batch tiles independent
            vmem_limit_bytes=_vmem_limit_bytes(),
        ),
    )(
        x_tbd,
        kp["wih_f"], kp["wih_b"], kp["b_f"], kp["b_b"], kp["whh_f"],
        kp["fcw_f"], kp["fcw_b"], kp["fc_b"],
    )
    return out[:B]


# ----------------------------- init & reference -----------------------------

def init_params(key, input_size, hidden=HIDDEN):
    """Deterministic init mimicking PyTorch's U(-1/sqrt(H), 1/sqrt(H)), PyTorch layout."""
    ks = jax.random.split(key, 12)
    s_lstm = 1.0 / jnp.sqrt(hidden)
    s_fc = 1.0 / jnp.sqrt(2 * hidden)

    def u(k, shape, s):
        return jax.random.uniform(k, shape, jnp.float32, -s, s)

    wih_f = u(ks[0], (4 * hidden, input_size), s_lstm)
    whh_f = u(ks[1], (4 * hidden, hidden), s_lstm)
    b_f = (u(ks[2], (4 * hidden,), s_lstm) + u(ks[3], (4 * hidden,), s_lstm)).reshape(1, -1)
    wih_b = u(ks[4], (4 * hidden, input_size), s_lstm)
    whh_b = u(ks[5], (4 * hidden, hidden), s_lstm)   # reference-only; unused by the kernel
    b_b = (u(ks[6], (4 * hidden,), s_lstm) + u(ks[7], (4 * hidden,), s_lstm)).reshape(1, -1)
    fc_w = u(ks[8], (1, 2 * hidden), s_fc)
    fc_b = u(ks[9], (1,), s_fc).reshape(1, 1)
    return dict(wih_f=wih_f, whh_f=whh_f, b_f=b_f,
                wih_b=wih_b, whh_b=whh_b, b_b=b_b,
                fc_w=fc_w, fc_b=fc_b)


def bilstm_reference(x, params, hidden=HIDDEN):
    """Pure-JAX reference of the PyTorch forward (for correctness check)."""
    B, T, D = x.shape
    H = hidden

    def cell(x_t, h, c, wih, whh, b):
        gates = x_t @ wih.T + h @ whh.T + b
        i = jax.nn.sigmoid(gates[:, 0:H])
        f = jax.nn.sigmoid(gates[:, H:2 * H])
        g = jnp.tanh(gates[:, 2 * H:3 * H])
        o = jax.nn.sigmoid(gates[:, 3 * H:4 * H])
        c = f * c + i * g
        return o * jnp.tanh(c), c

    h = jnp.zeros((B, H), jnp.float32)
    c = jnp.zeros((B, H), jnp.float32)
    for t in range(T):
        h, c = cell(x[:, t, :], h, c, params["wih_f"], params["whh_f"], params["b_f"])
    h_fwd = h

    h_bwd, _ = cell(x[:, T - 1, :],
                    jnp.zeros((B, H), jnp.float32), jnp.zeros((B, H), jnp.float32),
                    params["wih_b"], params["whh_b"], params["b_b"])

    feats = jnp.concatenate([h_fwd, h_bwd], axis=-1)
    return feats @ params["fc_w"].T + params["fc_b"]


if __name__ == "__main__":
    B, T, D = 2, 8, 16
    key = jax.random.PRNGKey(0)
    k_x, k_p = jax.random.split(key)
    x = jax.random.normal(k_x, (B, T, D), dtype=jnp.float32)

    params = init_params(k_p, input_size=D)
    packed = pack_params(params)               # pack_params(..., dtype=jnp.bfloat16) for bf16

    out = bilstm_forward(x, packed)
    out = jax.block_until_ready(out)

    ref = bilstm_reference(x, params)
    assert out.shape == (B, 1), out.shape
    assert jnp.allclose(out, ref, atol=5e-5, rtol=5e-5), (out, ref)

    print("KERNEL_OK")
</pallas_src>

<mosaic_0001>
module attributes {stable_mosaic.version = 11 : i64} {
  func.func @bilstm_kernel(%arg0: i32, %arg1: i32, %arg2: memref<8x8x16xf32, #tpu.memory_space<vmem>>, %arg3: memref<16x512xf32, #tpu.memory_space<vmem>>, %arg4: memref<16x512xf32, #tpu.memory_space<vmem>>, %arg5: memref<1x512xf32, #tpu.memory_space<vmem>>, %arg6: memref<1x512xf32, #tpu.memory_space<vmem>>, %arg7: memref<128x512xf32, #tpu.memory_space<vmem>>, %arg8: memref<1x128xf32, #tpu.memory_space<vmem>>, %arg9: memref<1x128xf32, #tpu.memory_space<vmem>>, %arg10: memref<1x1xf32, #tpu.memory_space<vmem>>, %arg11: memref<8x1xf32, #tpu.memory_space<vmem>>, %arg12: memref<8x8x512xf32, #tpu.memory_space<vmem>>, %arg13: memref<8x128xf32, #tpu.memory_space<vmem>>, %arg14: memref<8x128xf32, #tpu.memory_space<vmem>>) attributes {dimension_semantics = [#tpu.dimension_semantics<parallel>, #tpu.dimension_semantics<arbitrary>], iteration_bounds = array<i64: 1, 1>, scalar_prefetch = 0 : i64, scratch_operands = 3 : i64, tpu.core_type = #tpu.core_type<tc>, window_params = [{transform_indices = @transform_0, window_bounds = array<i64: 8, 8, 16>}, {pipeline_mode = #tpu.pipeline_mode<synchronous>, transform_indices = @transform_1, window_bounds = array<i64: 16, 512>}, {pipeline_mode = #tpu.pipeline_mode<synchronous>, transform_indices = @transform_2, window_bounds = array<i64: 16, 512>}, {pipeline_mode = #tpu.pipeline_mode<synchronous>, transform_indices = @transform_3, window_bounds = array<i64: 1, 512>}, {pipeline_mode = #tpu.pipeline_mode<synchronous>, transform_indices = @transform_4, window_bounds = array<i64: 1, 512>}, {pipeline_mode = #tpu.pipeline_mode<synchronous>, transform_indices = @transform_5, window_bounds = array<i64: 128, 512>}, {pipeline_mode = #tpu.pipeline_mode<synchronous>, transform_indices = @transform_6, window_bounds = array<i64: 1, 128>}, {pipeline_mode = #tpu.pipeline_mode<synchronous>, transform_indices = @transform_7, window_bounds = array<i64: 1, 128>}, {pipeline_mode = #tpu.pipeline_mode<synchronous>, transform_indices = @transform_8, window_bounds = array<i64: 1, 1>}, {transform_indices = @transform_9, window_bounds = array<i64: 8, 1>}]} {
    %c0_i32 = arith.constant 0 : i32
    %0 = arith.cmpi eq, %arg1, %c0_i32 : i32
    %1 = arith.extui %0 : i1 to i32
    %c0_i32_0 = arith.constant 0 : i32
    %2 = arith.cmpi ne, %1, %c0_i32_0 : i32
    scf.if %2 {
      %cst_133 = arith.constant 0.000000e+00 : f32
      %315 = vector.broadcast %cst_133 : f32 to vector<8x128xf32>
      %c0_134 = arith.constant 0 : index
      %c0_135 = arith.constant 0 : index
      %316 = vector.load %arg13[%c0_134, %c0_135] : memref<8x128xf32, #tpu.memory_space<vmem>>, vector<8x128xf32>
      tpu.vector_store %arg13[%c0_134, %c0_135], %315 {strides = array<i32>} : memref<8x128xf32, #tpu.memory_space<vmem>>, vector<8x128xf32>,
      %cst_136 = arith.constant 0.000000e+00 : f32
      %317 = vector.broadcast %cst_136 : f32 to vector<8x128xf32>
      %c0_137 = arith.constant 0 : index
      %c0_138 = arith.constant 0 : index
      %318 = vector.load %arg14[%c0_137, %c0_138] : memref<8x128xf32, #tpu.memory_space<vmem>>, vector<8x128xf32>
      tpu.vector_store %arg14[%c0_137, %c0_138], %317 {strides = array<i32>} : memref<8x128xf32, #tpu.memory_space<vmem>>, vector<8x128xf32>,
    } else {
    }
    %c0 = arith.constant 0 : index
    %c0_1 = arith.constant 0 : index
    %c0_2 = arith.constant 0 : index
    %3 = vector.load %arg2[%c0, %c0_1, %c0_2] : memref<8x8x16xf32, #tpu.memory_space<vmem>>, vector<8x8x16xf32>
    %4 = vector.shape_cast %3 : vector<8x8x16xf32> to vector<64x16xf32>
    %c0_3 = arith.constant 0 : index
    %c0_4 = arith.constant 0 : index
    %5 = vector.load %arg3[%c0_3, %c0_4] : memref<16x512xf32, #tpu.memory_space<vmem>>, vector<16x512xf32>
    %cst = arith.constant dense<0.000000e+00> : vector<64x512xf32>
    %6 = tpu.matmul %4, %5, %cst {dimension_numbers = #tpu.dot_dimension_numbers<[1], [0], [0], [1], [0, 0, 1, 1], [], []>} : vector<64x16xf32>, vector<16x512xf32>, vector<64x512xf32> -> vector<64x512xf32>
    %c0_5 = arith.constant 0 : index
    %c0_6 = arith.constant 0 : index
    %7 = vector.load %arg5[%c0_5, %c0_6] : memref<1x512xf32, #tpu.memory_space<vmem>>, vector<1x512xf32>
    %8 = vector.broadcast %7 : vector<1x512xf32> to vector<64x512xf32>
    %9 = arith.addf %6, %8 : vector<64x512xf32>
    %10 = vector.shape_cast %9 : vector<64x512xf32> to vector<8x8x512xf32>
    %c0_7 = arith.constant 0 : index
    %c0_8 = arith.constant 0 : index
    %c0_9 = arith.constant 0 : index
    %11 = vector.load %arg12[%c0_7, %c0_8, %c0_9] : memref<8x8x512xf32, #tpu.memory_space<vmem>>, vector<8x8x512xf32>
    tpu.vector_store %arg12[%c0_7, %c0_8, %c0_9], %10 {strides = array<i32>} : memref<8x8x512xf32, #tpu.memory_space<vmem>>, vector<8x8x512xf32>,
    %c0_10 = arith.constant 0 : index
    %c0_11 = arith.constant 0 : index
    %12 = vector.load %arg13[%c0_10, %c0_11] : memref<8x128xf32, #tpu.memory_space<vmem>>, vector<8x128xf32>
    %c0_12 = arith.constant 0 : index
    %c0_13 = arith.constant 0 : index
    %13 = vector.load %arg14[%c0_12, %c0_13] : memref<8x128xf32, #tpu.memory_space<vmem>>, vector<8x128xf32>
    %c0_i32_14 = arith.constant 0 : i32
    %14 = arith.index_cast %c0_i32_14 : i32 to index
    %c0_15 = arith.constant 0 : index
    %c0_16 = arith.constant 0 : index
    %15 = vector.load %arg12[%14, %c0_15, %c0_16] : memref<8x8x512xf32, #tpu.memory_space<vmem>>, vector<1x8x512xf32>
    %16 = vector.shape_cast %15 : vector<1x8x512xf32> to vector<8x512xf32>
    %c0_17 = arith.constant 0 : index
    %c0_18 = arith.constant 0 : index
    %17 = vector.load %arg7[%c0_17, %c0_18] : memref<128x512xf32, #tpu.memory_space<vmem>>, vector<128x512xf32>
    %cst_19 = arith.constant dense<0.000000e+00> : vector<8x512xf32>
    %18 = tpu.matmul %12, %17, %cst_19 {dimension_numbers = #tpu.dot_dimension_numbers<[1], [0], [0], [1], [0, 0, 1, 1], [], []>} : vector<8x128xf32>, vector<128x512xf32>, vector<8x512xf32> -> vector<8x512xf32>
    %19 = arith.addf %16, %18 : vector<8x512xf32>
    %20 = vector.extract_strided_slice %19 {offsets = [0, 0], sizes = [8, 128], strides = [1, 1]} : vector<8x512xf32> to vector<8x128xf32>
    %cst_20 = arith.constant 5.000000e-01 : f32
    %21 = vector.broadcast %cst_20 : f32 to vector<8x128xf32>
    %22 = arith.mulf %21, %20 : vector<8x128xf32>
    %23 = math.tanh %22 : vector<8x128xf32>
    %cst_21 = arith.constant 1.000000e+00 : f32
    %24 = vector.broadcast %cst_21 : f32 to vector<8x128xf32>
    %25 = arith.addf %23, %24 : vector<8x128xf32>
    %cst_22 = arith.constant 5.000000e-01 : f32
    %26 = vector.broadcast %cst_22 : f32 to vector<8x128xf32>
    %27 = arith.mulf %26, %25 : vector<8x128xf32>
    %28 = vector.extract_strided_slice %19 {offsets = [0, 128], sizes = [8, 128], strides = [1, 1]} : vector<8x512xf32> to vector<8x128xf32>
    %cst_23 = arith.constant 5.000000e-01 : f32
    %29 = vector.broadcast %cst_23 : f32 to vector<8x128xf32>
    %30 = arith.mulf %29, %28 : vector<8x128xf32>
    %31 = math.tanh %30 : vector<8x128xf32>
    %cst_24 = arith.constant 1.000000e+00 : f32
    %32 = vector.broadcast %cst_24 : f32 to vector<8x128xf32>
    %33 = arith.addf %31, %32 : vector<8x128xf32>
    %cst_25 = arith.constant 5.000000e-01 : f32
    %34 = vector.broadcast %cst_25 : f32 to vector<8x128xf32>
    %35 = arith.mulf %34, %33 : vector<8x128xf32>
    %36 = vector.extract_strided_slice %19 {offsets = [0, 256], sizes = [8, 128], strides = [1, 1]} : vector<8x512xf32> to vector<8x128xf32>
    %37 = math.tanh %36 : vector<8x128xf32>
    %38 = vector.extract_strided_slice %19 {offsets = [0, 384], sizes = [8, 128], strides = [1, 1]} : vector<8x512xf32> to vector<8x128xf32>
    %cst_26 = arith.constant 5.000000e-01 : f32
    %39 = vector.broadcast %cst_26 : f32 to vector<8x128xf32>
    %40 = arith.mulf %39, %38 : vector<8x128xf32>
    %41 = math.tanh %40 : vector<8x128xf32>
    %cst_27 = arith.constant 1.000000e+00 : f32
    %42 = vector.broadcast %cst_27 : f32 to vector<8x128xf32>
    %43 = arith.addf %41, %42 : vector<8x128xf32>
    %cst_28 = arith.constant 5.000000e-01 : f32
    %44 = vector.broadcast %cst_28 : f32 to vector<8x128xf32>
    %45 = arith.mulf %44, %43 : vector<8x128xf32>
    %46 = arith.mulf %35, %13 : vector<8x128xf32>
    %47 = arith.mulf %27, %37 : vector<8x128xf32>
    %48 = arith.addf %46, %47 : vector<8x128xf32>
    %49 = math.tanh %48 : vector<8x128xf32>
    %50 = arith.mulf %45, %49 : vector<8x128xf32>
    %c1_i32 = arith.constant 1 : i32
    %51 = arith.index_cast %c1_i32 : i32 to index
    %c0_29 = arith.constant 0 : index
    %c0_30 = arith.constant 0 : index
    %52 = vector.load %arg12[%51, %c0_29, %c0_30] : memref<8x8x512xf32, #tpu.memory_space<vmem>>, vector<1x8x512xf32>
    %53 = vector.shape_cast %52 : vector<1x8x512xf32> to vector<8x512xf32>
    %c0_31 = arith.constant 0 : index
    %c0_32 = arith.constant 0 : index
    %54 = vector.load %arg7[%c0_31, %c0_32] : memref<128x512xf32, #tpu.memory_space<vmem>>, vector<128x512xf32>
    %cst_33 = arith.constant dense<0.000000e+00> : vector<8x512xf32>
    %55 = tpu.matmul %50, %54, %cst_33 {dimension_numbers = #tpu.dot_dimension_numbers<[1], [0], [0], [1], [0, 0, 1, 1], [], []>} : vector<8x128xf32>, vector<128x512xf32>, vector<8x512xf32> -> vector<8x512xf32>
    %56 = arith.addf %53, %55 : vector<8x512xf32>
    %57 = vector.extract_strided_slice %56 {offsets = [0, 0], sizes = [8, 128], strides = [1, 1]} : vector<8x512xf32> to vector<8x128xf32>
    %cst_34 = arith.constant 5.000000e-01 : f32
    %58 = vector.broadcast %cst_34 : f32 to vector<8x128xf32>
    %59 = arith.mulf %58, %57 : vector<8x128xf32>
    %60 = math.tanh %59 : vector<8x128xf32>
    %cst_35 = arith.constant 1.000000e+00 : f32
    %61 = vector.broadcast %cst_35 : f32 to vector<8x128xf32>
    %62 = arith.addf %60, %61 : vector<8x128xf32>
    %cst_36 = arith.constant 5.000000e-01 : f32
    %63 = vector.broadcast %cst_36 : f32 to vector<8x128xf32>
    %64 = arith.mulf %63, %62 : vector<8x128xf32>
    %65 = vector.extract_strided_slice %56 {offsets = [0, 128], sizes = [8, 128], strides = [1, 1]} : vector<8x512xf32> to vector<8x128xf32>
    %cst_37 = arith.constant 5.000000e-01 : f32
    %66 = vector.broadcast %cst_37 : f32 to vector<8x128xf32>
    %67 = arith.mulf %66, %65 : vector<8x128xf32>
    %68 = math.tanh %67 : vector<8x128xf32>
    %cst_38 = arith.constant 1.000000e+00 : f32
    %69 = vector.broadcast %cst_38 : f32 to vector<8x128xf32>
    %70 = arith.addf %68, %69 : vector<8x128xf32>
    %cst_39 = arith.constant 5.000000e-01 : f32
    %71 = vector.broadcast %cst_39 : f32 to vector<8x128xf32>
    %72 = arith.mulf %71, %70 : vector<8x128xf32>
    %73 = vector.extract_strided_slice %56 {offsets = [0, 256], sizes = [8, 128], strides = [1, 1]} : vector<8x512xf32> to vector<8x128xf32>
    %74 = math.tanh %73 : vector<8x128xf32>
    %75 = vector.extract_strided_slice %56 {offsets = [0, 384], sizes = [8, 128], strides = [1, 1]} : vector<8x512xf32> to vector<8x128xf32>
    %cst_40 = arith.constant 5.000000e-01 : f32
    %76 = vector.broadcast %cst_40 : f32 to vector<8x128xf32>
    %77 = arith.mulf %76, %75 : vector<8x128xf32>
    %78 = math.tanh %77 : vector<8x128xf32>
    %cst_41 = arith.constant 1.000000e+00 : f32
    %79 = vector.broadcast %cst_41 : f32 to vector<8x128xf32>
    %80 = arith.addf %78, %79 : vector<8x128xf32>
    %cst_42 = arith.constant 5.000000e-01 : f32
    %81 = vector.broadcast %cst_42 : f32 to vector<8x128xf32>
    %82 = arith.mulf %81, %80 : vector<8x128xf32>
    %83 = arith.mulf %72, %48 : vector<8x128xf32>
    %84 = arith.mulf %64, %74 : vector<8x128xf32>
    %85 = arith.addf %83, %84 : vector<8x128xf32>
    %86 = math.tanh %85 : vector<8x128xf32>
    %87 = arith.mulf %82, %86 : vector<8x128xf32>
    %c2_i32 = arith.constant 2 : i32
    %88 = arith.index_cast %c2_i32 : i32 to index
    %c0_43 = arith.constant 0 : index
    %c0_44 = arith.constant 0 : index
    %89 = vector.load %arg12[%88, %c0_43, %c0_44] : memref<8x8x512xf32, #tpu.memory_space<vmem>>, vector<1x8x512xf32>
    %90 = vector.shape_cast %89 : vector<1x8x512xf32> to vector<8x512xf32>
    %c0_45 = arith.constant 0 : index
    %c0_46 = arith.constant 0 : index
    %91 = vector.load %arg7[%c0_45, %c0_46] : memref<128x512xf32, #tpu.memory_space<vmem>>, vector<128x512xf32>
    %cst_47 = arith.constant dense<0.000000e+00> : vector<8x512xf32>
    %92 = tpu.matmul %87, %91, %cst_47 {dimension_numbers = #tpu.dot_dimension_numbers<[1], [0], [0], [1], [0, 0, 1, 1], [], []>} : vector<8x128xf32>, vector<128x512xf32>, vector<8x512xf32> -> vector<8x512xf32>
    %93 = arith.addf %90, %92 : vector<8x512xf32>
    %94 = vector.extract_strided_slice %93 {offsets = [0, 0], sizes = [8, 128], strides = [1, 1]} : vector<8x512xf32> to vector<8x128xf32>
    %cst_48 = arith.constant 5.000000e-01 : f32
    %95 = vector.broadcast %cst_48 : f32 to vector<8x128xf32>
    %96 = arith.mulf %95, %94 : vector<8x128xf32>
    %97 = math.tanh %96 : vector<8x128xf32>
    %cst_49 = arith.constant 1.000000e+00 : f32
    %98 = vector.broadcast %cst_49 : f32 to vector<8x128xf32>
    %99 = arith.addf %97, %98 : vector<8x128xf32>
    %cst_50 = arith.constant 5.000000e-01 : f32
    %100 = vector.broadcast %cst_50 : f32 to vector<8x128xf32>
    %101 = arith.mulf %100, %99 : vector<8x128xf32>
    %102 = vector.extract_strided_slice %93 {offsets = [0, 128], sizes = [8, 128], strides = [1, 1]} : vector<8x512xf32> to vector<8x128xf32>
    %cst_51 = arith.constant 5.000000e-01 : f32
    %103 = vector.broadcast %cst_51 : f32 to vector<8x128xf32>
    %104 = arith.mulf %103, %102 : vector<8x128xf32>
    %105 = math.tanh %104 : vector<8x128xf32>
    %cst_52 = arith.constant 1.000000e+00 : f32
    %106 = vector.broadcast %cst_52 : f32 to vector<8x128xf32>
    %107 = arith.addf %105, %106 : vector<8x128xf32>
    %cst_53 = arith.constant 5.000000e-01 : f32
    %108 = vector.broadcast %cst_53 : f32 to vector<8x128xf32>
    %109 = arith.mulf %108, %107 : vector<8x128xf32>
    %110 = vector.extract_strided_slice %93 {offsets = [0, 256], sizes = [8, 128], strides = [1, 1]} : vector<8x512xf32> to vector<8x128xf32>
    %111 = math.tanh %110 : vector<8x128xf32>
    %112 = vector.extract_strided_slice %93 {offsets = [0, 384], sizes = [8, 128], strides = [1, 1]} : vector<8x512xf32> to vector<8x128xf32>
    %cst_54 = arith.constant 5.000000e-01 : f32
    %113 = vector.broadcast %cst_54 : f32 to vector<8x128xf32>
    %114 = arith.mulf %113, %112 : vector<8x128xf32>
    %115 = math.tanh %114 : vector<8x128xf32>
    %cst_55 = arith.constant 1.000000e+00 : f32
    %116 = vector.broadcast %cst_55 : f32 to vector<8x128xf32>
    %117 = arith.addf %115, %116 : vector<8x128xf32>
    %cst_56 = arith.constant 5.000000e-01 : f32
    %118 = vector.broadcast %cst_56 : f32 to vector<8x128xf32>
    %119 = arith.mulf %118, %117 : vector<8x128xf32>
    %120 = arith.mulf %109, %85 : vector<8x128xf32>
    %121 = arith.mulf %101, %111 : vector<8x128xf32>
    %122 = arith.addf %120, %121 : vector<8x128xf32>
    %123 = math.tanh %122 : vector<8x128xf32>
    %124 = arith.mulf %119, %123 : vector<8x128xf32>
    %c3_i32 = arith.constant 3 : i32
    %125 = arith.index_cast %c3_i32 : i32 to index
    %c0_57 = arith.constant 0 : index
    %c0_58 = arith.constant 0 : index
    %126 = vector.load %arg12[%125, %c0_57, %c0_58] : memref<8x8x512xf32, #tpu.memory_space<vmem>>, vector<1x8x512xf32>
    %127 = vector.shape_cast %126 : vector<1x8x512xf32> to vector<8x512xf32>
    %c0_59 = arith.constant 0 : index
    %c0_60 = arith.constant 0 : index
    %128 = vector.load %arg7[%c0_59, %c0_60] : memref<128x512xf32, #tpu.memory_space<vmem>>, vector<128x512xf32>
    %cst_61 = arith.constant dense<0.000000e+00> : vector<8x512xf32>
    %129 = tpu.matmul %124, %128, %cst_61 {dimension_numbers = #tpu.dot_dimension_numbers<[1], [0], [0], [1], [0, 0, 1, 1], [], []>} : vector<8x128xf32>, vector<128x512xf32>, vector<8x512xf32> -> vector<8x512xf32>
    %130 = arith.addf %127, %129 : vector<8x512xf32>
    %131 = vector.extract_strided_slice %130 {offsets = [0, 0], sizes = [8, 128], strides = [1, 1]} : vector<8x512xf32> to vector<8x128xf32>
    %cst_62 = arith.constant 5.000000e-01 : f32
    %132 = vector.broadcast %cst_62 : f32 to vector<8x128xf32>
    %133 = arith.mulf %132, %131 : vector<8x128xf32>
    %134 = math.tanh %133 : vector<8x128xf32>
    %cst_63 = arith.constant 1.000000e+00 : f32
    %135 = vector.broadcast %cst_63 : f32 to vector<8x128xf32>
    %136 = arith.addf %134, %135 : vector<8x128xf32>
    %cst_64 = arith.constant 5.000000e-01 : f32
    %137 = vector.broadcast %cst_64 : f32 to vector<8x128xf32>
    %138 = arith.mulf %137, %136 : vector<8x128xf32>
    %139 = vector.extract_strided_slice %130 {offsets = [0, 128], sizes = [8, 128], strides = [1, 1]} : vector<8x512xf32> to vector<8x128xf32>
    %cst_65 = arith.constant 5.000000e-01 : f32
    %140 = vector.broadcast %cst_65 : f32 to vector<8x128xf32>
    %141 = arith.mulf %140, %139 : vector<8x128xf32>
    %142 = math.tanh %141 : vector<8x128xf32>
    %cst_66 = arith.constant 1.000000e+00 : f32
    %143 = vector.broadcast %cst_66 : f32 to vector<8x128xf32>
    %144 = arith.addf %142, %143 : vector<8x128xf32>
    %cst_67 = arith.constant 5.000000e-01 : f32
    %145 = vector.broadcast %cst_67 : f32 to vector<8x128xf32>
    %146 = arith.mulf %145, %144 : vector<8x128xf32>
    %147 = vector.extract_strided_slice %130 {offsets = [0, 256], sizes = [8, 128], strides = [1, 1]} : vector<8x512xf32> to vector<8x128xf32>
    %148 = math.tanh %147 : vector<8x128xf32>
    %149 = vector.extract_strided_slice %130 {offsets = [0, 384], sizes = [8, 128], strides = [1, 1]} : vector<8x512xf32> to vector<8x128xf32>
    %cst_68 = arith.constant 5.000000e-01 : f32
    %150 = vector.broadcast %cst_68 : f32 to vector<8x128xf32>
    %151 = arith.mulf %150, %149 : vector<8x128xf32>
    %152 = math.tanh %151 : vector<8x128xf32>
    %cst_69 = arith.constant 1.000000e+00 : f32
    %153 = vector.broadcast %cst_69 : f32 to vector<8x128xf32>
    %154 = arith.addf %152, %153 : vector<8x128xf32>
    %cst_70 = arith.constant 5.000000e-01 : f32
    %155 = vector.broadcast %cst_70 : f32 to vector<8x128xf32>
    %156 = arith.mulf %155, %154 : vector<8x128xf32>
    %157 = arith.mulf %146, %122 : vector<8x128xf32>
    %158 = arith.mulf %138, %148 : vector<8x128xf32>
    %159 = arith.addf %157, %158 : vector<8x128xf32>
    %160 = math.tanh %159 : vector<8x128xf32>
    %161 = arith.mulf %156, %160 : vector<8x128xf32>
    %c4_i32 = arith.constant 4 : i32
    %162 = arith.index_cast %c4_i32 : i32 to index
    %c0_71 = arith.constant 0 : index
    %c0_72 = arith.constant 0 : index
    %163 = vector.load %arg12[%162, %c0_71, %c0_72] : memref<8x8x512xf32, #tpu.memory_space<vmem>>, vector<1x8x512xf32>
    %164 = vector.shape_cast %163 : vector<1x8x512xf32> to vector<8x512xf32>
    %c0_73 = arith.constant 0 : index
    %c0_74 = arith.constant 0 : index
    %165 = vector.load %arg7[%c0_73, %c0_74] : memref<128x512xf32, #tpu.memory_space<vmem>>, vector<128x512xf32>
    %cst_75 = arith.constant dense<0.000000e+00> : vector<8x512xf32>
    %166 = tpu.matmul %161, %165, %cst_75 {dimension_numbers = #tpu.dot_dimension_numbers<[1], [0], [0], [1], [0, 0, 1, 1], [], []>} : vector<8x128xf32>, vector<128x512xf32>, vector<8x512xf32> -> vector<8x512xf32>
    %167 = arith.addf %164, %166 : vector<8x512xf32>
    %168 = vector.extract_strided_slice %167 {offsets = [0, 0], sizes = [8, 128], strides = [1, 1]} : vector<8x512xf32> to vector<8x128xf32>
    %cst_76 = arith.constant 5.000000e-01 : f32
    %169 = vector.broadcast %cst_76 : f32 to vector<8x128xf32>
    %170 = arith.mulf %169, %168 : vector<8x128xf32>
    %171 = math.tanh %170 : vector<8x128xf32>
    %cst_77 = arith.constant 1.000000e+00 : f32
    %172 = vector.broadcast %cst_77 : f32 to vector<8x128xf32>
    %173 = arith.addf %171, %172 : vector<8x128xf32>
    %cst_78 = arith.constant 5.000000e-01 : f32
    %174 = vector.broadcast %cst_78 : f32 to vector<8x128xf32>
    %175 = arith.mulf %174, %173 : vector<8x128xf32>
    %176 = vector.extract_strided_slice %167 {offsets = [0, 128], sizes = [8, 128], strides = [1, 1]} : vector<8x512xf32> to vector<8x128xf32>
    %cst_79 = arith.constant 5.000000e-01 : f32
    %177 = vector.broadcast %cst_79 : f32 to vector<8x128xf32>
    %178 = arith.mulf %177, %176 : vector<8x128xf32>
    %179 = math.tanh %178 : vector<8x128xf32>
    %cst_80 = arith.constant 1.000000e+00 : f32
    %180 = vector.broadcast %cst_80 : f32 to vector<8x128xf32>
    %181 = arith.addf %179, %180 : vector<8x128xf32>
    %cst_81 = arith.constant 5.000000e-01 : f32
    %182 = vector.broadcast %cst_81 : f32 to vector<8x128xf32>
    %183 = arith.mulf %182, %181 : vector<8x128xf32>
    %184 = vector.extract_strided_slice %167 {offsets = [0, 256], sizes = [8, 128], strides = [1, 1]} : vector<8x512xf32> to vector<8x128xf32>
    %185 = math.tanh %184 : vector<8x128xf32>
    %186 = vector.extract_strided_slice %167 {offsets = [0, 384], sizes = [8, 128], strides = [1, 1]} : vector<8x512xf32> to vector<8x128xf32>
    %cst_82 = arith.constant 5.000000e-01 : f32
    %187 = vector.broadcast %cst_82 : f32 to vector<8x128xf32>
    %188 = arith.mulf %187, %186 : vector<8x128xf32>
    %189 = math.tanh %188 : vector<8x128xf32>
    %cst_83 = arith.constant 1.000000e+00 : f32
    %190 = vector.broadcast %cst_83 : f32 to vector<8x128xf32>
    %191 = arith.addf %189, %190 : vector<8x128xf32>
    %cst_84 = arith.constant 5.000000e-01 : f32
    %192 = vector.broadcast %cst_84 : f32 to vector<8x128xf32>
    %193 = arith.mulf %192, %191 : vector<8x128xf32>
    %194 = arith.mulf %183, %159 : vector<8x128xf32>
    %195 = arith.mulf %175, %185 : vector<8x128xf32>
    %196 = arith.addf %194, %195 : vector<8x128xf32>
    %197 = math.tanh %196 : vector<8x128xf32>
    %198 = arith.mulf %193, %197 : vector<8x128xf32>
    %c5_i32 = arith.constant 5 : i32
    %199 = arith.index_cast %c5_i32 : i32 to index
    %c0_85 = arith.constant 0 : index
    %c0_86 = arith.constant 0 : index
    %200 = vector.load %arg12[%199, %c0_85, %c0_86] : memref<8x8x512xf32, #tpu.memory_space<vmem>>, vector<1x8x512xf32>
    %201 = vector.shape_cast %200 : vector<1x8x512xf32> to vector<8x512xf32>
    %c0_87 = arith.constant 0 : index
    %c0_88 = arith.constant 0 : index
    %202 = vector.load %arg7[%c0_87, %c0_88] : memref<128x512xf32, #tpu.memory_space<vmem>>, vector<128x512xf32>
    %cst_89 = arith.constant dense<0.000000e+00> : vector<8x512xf32>
    %203 = tpu.matmul %198, %202, %cst_89 {dimension_numbers = #tpu.dot_dimension_numbers<[1], [0], [0], [1], [0, 0, 1, 1], [], []>} : vector<8x128xf32>, vector<128x512xf32>, vector<8x512xf32> -> vector<8x512xf32>
    %204 = arith.addf %201, %203 : vector<8x512xf32>
    %205 = vector.extract_strided_slice %204 {offsets = [0, 0], sizes = [8, 128], strides = [1, 1]} : vector<8x512xf32> to vector<8x128xf32>
    %cst_90 = arith.constant 5.000000e-01 : f32
    %206 = vector.broadcast %cst_90 : f32 to vector<8x128xf32>
    %207 = arith.mulf %206, %205 : vector<8x128xf32>
    %208 = math.tanh %207 : vector<8x128xf32>
    %cst_91 = arith.constant 1.000000e+00 : f32
    %209 = vector.broadcast %cst_91 : f32 to vector<8x128xf32>
    %210 = arith.addf %208, %209 : vector<8x128xf32>
    %cst_92 = arith.constant 5.000000e-01 : f32
    %211 = vector.broadcast %cst_92 : f32 to vector<8x128xf32>
    %212 = arith.mulf %211, %210 : vector<8x128xf32>
    %213 = vector.extract_strided_slice %204 {offsets = [0, 128], sizes = [8, 128], strides = [1, 1]} : vector<8x512xf32> to vector<8x128xf32>
    %cst_93 = arith.constant 5.000000e-01 : f32
    %214 = vector.broadcast %cst_93 : f32 to vector<8x128xf32>
    %215 = arith.mulf %214, %213 : vector<8x128xf32>
    %216 = math.tanh %215 : vector<8x128xf32>
    %cst_94 = arith.constant 1.000000e+00 : f32
    %217 = vector.broadcast %cst_94 : f32 to vector<8x128xf32>
    %218 = arith.addf %216, %217 : vector<8x128xf32>
    %cst_95 = arith.constant 5.000000e-01 : f32
    %219 = vector.broadcast %cst_95 : f32 to vector<8x128xf32>
    %220 = arith.mulf %219, %218 : vector<8x128xf32>
    %221 = vector.extract_strided_slice %204 {offsets = [0, 256], sizes = [8, 128], strides = [1, 1]} : vector<8x512xf32> to vector<8x128xf32>
    %222 = math.tanh %221 : vector<8x128xf32>
    %223 = vector.extract_strided_slice %204 {offsets = [0, 384], sizes = [8, 128], strides = [1, 1]} : vector<8x512xf32> to vector<8x128xf32>
    %cst_96 = arith.constant 5.000000e-01 : f32
    %224 = vector.broadcast %cst_96 : f32 to vector<8x128xf32>
    %225 = arith.mulf %224, %223 : vector<8x128xf32>
    %226 = math.tanh %225 : vector<8x128xf32>
    %cst_97 = arith.constant 1.000000e+00 : f32
    %227 = vector.broadcast %cst_97 : f32 to vector<8x128xf32>
    %228 = arith.addf %226, %227 : vector<8x128xf32>
    %cst_98 = arith.constant 5.000000e-01 : f32
    %229 = vector.broadcast %cst_98 : f32 to vector<8x128xf32>
    %230 = arith.mulf %229, %228 : vector<8x128xf32>
    %231 = arith.mulf %220, %196 : vector<8x128xf32>
    %232 = arith.mulf %212, %222 : vector<8x128xf32>
    %233 = arith.addf %231, %232 : vector<8x128xf32>
    %234 = math.tanh %233 : vector<8x128xf32>
    %235 = arith.mulf %230, %234 : vector<8x128xf32>
    %c6_i32 = arith.constant 6 : i32
    %236 = arith.index_cast %c6_i32 : i32 to index
    %c0_99 = arith.constant 0 : index
    %c0_100 = arith.constant 0 : index
    %237 = vector.load %arg12[%236, %c0_99, %c0_100] : memref<8x8x512xf32, #tpu.memory_space<vmem>>, vector<1x8x512xf32>
    %238 = vector.shape_cast %237 : vector<1x8x512xf32> to vector<8x512xf32>
    %c0_101 = arith.constant 0 : index
    %c0_102 = arith.constant 0 : index
    %239 = vector.load %arg7[%c0_101, %c0_102] : memref<128x512xf32, #tpu.memory_space<vmem>>, vector<128x512xf32>
    %cst_103 = arith.constant dense<0.000000e+00> : vector<8x512xf32>
    %240 = tpu.matmul %235, %239, %cst_103 {dimension_numbers = #tpu.dot_dimension_numbers<[1], [0], [0], [1], [0, 0, 1, 1], [], []>} : vector<8x128xf32>, vector<128x512xf32>, vector<8x512xf32> -> vector<8x512xf32>
    %241 = arith.addf %238, %240 : vector<8x512xf32>
    %242 = vector.extract_strided_slice %241 {offsets = [0, 0], sizes = [8, 128], strides = [1, 1]} : vector<8x512xf32> to vector<8x128xf32>
    %cst_104 = arith.constant 5.000000e-01 : f32
    %243 = vector.broadcast %cst_104 : f32 to vector<8x128xf32>
    %244 = arith.mulf %243, %242 : vector<8x128xf32>
    %245 = math.tanh %244 : vector<8x128xf32>
    %cst_105 = arith.constant 1.000000e+00 : f32
    %246 = vector.broadcast %cst_105 : f32 to vector<8x128xf32>
    %247 = arith.addf %245, %246 : vector<8x128xf32>
    %cst_106 = arith.constant 5.000000e-01 : f32
    %248 = vector.broadcast %cst_106 : f32 to vector<8x128xf32>
    %249 = arith.mulf %248, %247 : vector<8x128xf32>
    %250 = vector.extract_strided_slice %241 {offsets = [0, 128], sizes = [8, 128], strides = [1, 1]} : vector<8x512xf32> to vector<8x128xf32>
    %cst_107 = arith.constant 5.000000e-01 : f32
    %251 = vector.broadcast %cst_107 : f32 to vector<8x128xf32>
    %252 = arith.mulf %251, %250 : vector<8x128xf32>
    %253 = math.tanh %252 : vector<8x128xf32>
    %cst_108 = arith.constant 1.000000e+00 : f32
    %254 = vector.broadcast %cst_108 : f32 to vector<8x128xf32>
    %255 = arith.addf %253, %254 : vector<8x128xf32>
    %cst_109 = arith.constant 5.000000e-01 : f32
    %256 = vector.broadcast %cst_109 : f32 to vector<8x128xf32>
    %257 = arith.mulf %256, %255 : vector<8x128xf32>
    %258 = vector.extract_strided_slice %241 {offsets = [0, 256], sizes = [8, 128], strides = [1, 1]} : vector<8x512xf32> to vector<8x128xf32>
    %259 = math.tanh %258 : vector<8x128xf32>
    %260 = vector.extract_strided_slice %241 {offsets = [0, 384], sizes = [8, 128], strides = [1, 1]} : vector<8x512xf32> to vector<8x128xf32>
    %cst_110 = arith.constant 5.000000e-01 : f32
    %261 = vector.broadcast %cst_110 : f32 to vector<8x128xf32>
    %262 = arith.mulf %261, %260 : vector<8x128xf32>
    %263 = math.tanh %262 : vector<8x128xf32>
    %cst_111 = arith.constant 1.000000e+00 : f32
    %264 = vector.broadcast %cst_111 : f32 to vector<8x128xf32>
    %265 = arith.addf %263, %264 : vector<8x128xf32>
    %cst_112 = arith.constant 5.000000e-01 : f32
    %266 = vector.broadcast %cst_112 : f32 to vector<8x128xf32>
    %267 = arith.mulf %266, %265 : vector<8x128xf32>
    %268 = arith.mulf %257, %233 : vector<8x128xf32>
    %269 = arith.mulf %249, %259 : vector<8x128xf32>
    %270 = arith.addf %268, %269 : vector<8x128xf32>
    %271 = math.tanh %270 : vector<8x128xf32>
    %272 = arith.mulf %267, %271 : vector<8x128xf32>
    %c7_i32 = arith.constant 7 : i32
    %273 = arith.index_cast %c7_i32 : i32 to index
    %c0_113 = arith.constant 0 : index
    %c0_114 = arith.constant 0 : index
    %274 = vector.load %arg12[%273, %c0_113, %c0_114] : memref<8x8x512xf32, #tpu.memory_space<vmem>>, vector<1x8x512xf32>
    %275 = vector.shape_cast %274 : vector<1x8x512xf32> to vector<8x512xf32>
    %c0_115 = arith.constant 0 : index
    %c0_116 = arith.constant 0 : index
    %276 = vector.load %arg7[%c0_115, %c0_116] : memref<128x512xf32, #tpu.memory_space<vmem>>, vector<128x512xf32>
    %cst_117 = arith.constant dense<0.000000e+00> : vector<8x512xf32>
    %277 = tpu.matmul %272, %276, %cst_117 {dimension_numbers = #tpu.dot_dimension_numbers<[1], [0], [0], [1], [0, 0, 1, 1], [], []>} : vector<8x128xf32>, vector<128x512xf32>, vector<8x512xf32> -> vector<8x512xf32>
    %278 = arith.addf %275, %277 : vector<8x512xf32>
    %279 = vector.extract_strided_slice %278 {offsets = [0, 0], sizes = [8, 128], strides = [1, 1]} : vector<8x512xf32> to vector<8x128xf32>
    %cst_118 = arith.constant 5.000000e-01 : f32
    %280 = vector.broadcast %cst_118 : f32 to vector<8x128xf32>
    %281 = arith.mulf %280, %279 : vector<8x128xf32>
    %282 = math.tanh %281 : vector<8x128xf32>
    %cst_119 = arith.constant 1.000000e+00 : f32
    %283 = vector.broadcast %cst_119 : f32 to vector<8x128xf32>
    %284 = arith.addf %282, %283 : vector<8x128xf32>
    %cst_120 = arith.constant 5.000000e-01 : f32
    %285 = vector.broadcast %cst_120 : f32 to vector<8x128xf32>
    %286 = arith.mulf %285, %284 : vector<8x128xf32>
    %287 = vector.extract_strided_slice %278 {offsets = [0, 128], sizes = [8, 128], strides = [1, 1]} : vector<8x512xf32> to vector<8x128xf32>
    %cst_121 = arith.constant 5.000000e-01 : f32
    %288 = vector.broadcast %cst_121 : f32 to vector<8x128xf32>
    %289 = arith.mulf %288, %287 : vector<8x128xf32>
    %290 = math.tanh %289 : vector<8x128xf32>
    %cst_122 = arith.constant 1.000000e+00 : f32
    %291 = vector.broadcast %cst_122 : f32 to vector<8x128xf32>
    %292 = arith.addf %290, %291 : vector<8x128xf32>
    %cst_123 = arith.constant 5.000000e-01 : f32
    %293 = vector.broadcast %cst_123 : f32 to vector<8x128xf32>
    %294 = arith.mulf %293, %292 : vector<8x128xf32>
    %295 = vector.extract_strided_slice %278 {offsets = [0, 256], sizes = [8, 128], strides = [1, 1]} : vector<8x512xf32> to vector<8x128xf32>
    %296 = math.tanh %295 : vector<8x128xf32>
    %297 = vector.extract_strided_slice %278 {offsets = [0, 384], sizes = [8, 128], strides = [1, 1]} : vector<8x512xf32> to vector<8x128xf32>
    %cst_124 = arith.constant 5.000000e-01 : f32
    %298 = vector.broadcast %cst_124 : f32 to vector<8x128xf32>
    %299 = arith.mulf %298, %297 : vector<8x128xf32>
    %300 = math.tanh %299 : vector<8x128xf32>
    %cst_125 = arith.constant 1.000000e+00 : f32
    %301 = vector.broadcast %cst_125 : f32 to vector<8x128xf32>
    %302 = arith.addf %300, %301 : vector<8x128xf32>
    %cst_126 = arith.constant 5.000000e-01 : f32
    %303 = vector.broadcast %cst_126 : f32 to vector<8x128xf32>
    %304 = arith.mulf %303, %302 : vector<8x128xf32>
    %305 = arith.mulf %294, %270 : vector<8x128xf32>
    %306 = arith.mulf %286, %296 : vector<8x128xf32>
    %307 = arith.addf %305, %306 : vector<8x128xf32>
    %308 = math.tanh %307 : vector<8x128xf32>
    %309 = arith.mulf %304, %308 : vector<8x128xf32>
    %c8_i32 = arith.constant 8 : i32
    %c0_127 = arith.constant 0 : index
    %c0_128 = arith.constant 0 : index
    %310 = vector.load %arg13[%c0_127, %c0_128] : memref<8x128xf32, #tpu.memory_space<vmem>>, vector<8x128xf32>
    tpu.vector_store %arg13[%c0_127, %c0_128], %309 {strides = array<i32>} : memref<8x128xf32, #tpu.memory_space<vmem>>, vector<8x128xf32>,
    %c0_129 = arith.constant 0 : index
    %c0_130 = arith.constant 0 : index
    %311 = vector.load %arg14[%c0_129, %c0_130] : memref<8x128xf32, #tpu.memory_space<vmem>>, vector<8x128xf32>
    tpu.vector_store %arg14[%c0_129, %c0_130], %307 {strides = array<i32>} : memref<8x128xf32, #tpu.memory_space<vmem>>, vector<8x128xf32>,
    %c0_i32_131 = arith.constant 0 : i32
    %312 = arith.cmpi eq, %arg1, %c0_i32_131 : i32
    %313 = arith.extui %312 : i1 to i32
    %c0_i32_132 = arith.constant 0 : i32
    %314 = arith.cmpi ne, %313, %c0_i32_132 : i32
    scf.if %314 {
      %c7 = arith.constant 7 : index
      %c0_133 = arith.constant 0 : index
      %c0_134 = arith.constant 0 : index
      %315 = vector.load %arg2[%c7, %c0_133, %c0_134] : memref<8x8x16xf32, #tpu.memory_space<vmem>>, vector<1x8x16xf32>
      %316 = vector.shape_cast %315 : vector<1x8x16xf32> to vector<8x16xf32>
      %c0_135 = arith.constant 0 : index
      %c0_136 = arith.constant 0 : index
      %317 = vector.load %arg4[%c0_135, %c0_136] : memref<16x512xf32, #tpu.memory_space<vmem>>, vector<16x512xf32>
      %cst_137 = arith.constant dense<0.000000e+00> : vector<8x512xf32>
      %318 = tpu.matmul %316, %317, %cst_137 {dimension_numbers = #tpu.dot_dimension_numbers<[1], [0], [0], [1], [0, 0, 1, 1], [], []>} : vector<8x16xf32>, vector<16x512xf32>, vector<8x512xf32> -> vector<8x512xf32>
      %c0_138 = arith.constant 0 : index
      %c0_139 = arith.constant 0 : index
      %319 = vector.load %arg6[%c0_138, %c0_139] : memref<1x512xf32, #tpu.memory_space<vmem>>, vector<1x512xf32>
      %320 = vector.broadcast %319 : vector<1x512xf32> to vector<8x512xf32>
      %321 = arith.addf %318, %320 : vector<8x512xf32>
      %322 = vector.extract_strided_slice %321 {offsets = [0, 0], sizes = [8, 128], strides = [1, 1]} : vector<8x512xf32> to vector<8x128xf32>
      %cst_140 = arith.constant 5.000000e-01 : f32
      %323 = vector.broadcast %cst_140 : f32 to vector<8x128xf32>
      %324 = arith.mulf %323, %322 : vector<8x128xf32>
      %325 = math.tanh %324 : vector<8x128xf32>
      %cst_141 = arith.constant 1.000000e+00 : f32
      %326 = vector.broadcast %cst_141 : f32 to vector<8x128xf32>
      %327 = arith.addf %325, %326 : vector<8x128xf32>
      %cst_142 = arith.constant 5.000000e-01 : f32
      %328 = vector.broadcast %cst_142 : f32 to vector<8x128xf32>
      %329 = arith.mulf %328, %327 : vector<8x128xf32>
      %330 = vector.extract_strided_slice %321 {offsets = [0, 256], sizes = [8, 128], strides = [1, 1]} : vector<8x512xf32> to vector<8x128xf32>
      %331 = math.tanh %330 : vector<8x128xf32>
      %332 = vector.extract_strided_slice %321 {offsets = [0, 384], sizes = [8, 128], strides = [1, 1]} : vector<8x512xf32> to vector<8x128xf32>
      %cst_143 = arith.constant 5.000000e-01 : f32
      %333 = vector.broadcast %cst_143 : f32 to vector<8x128xf32>
      %334 = arith.mulf %333, %332 : vector<8x128xf32>
      %335 = math.tanh %334 : vector<8x128xf32>
      %cst_144 = arith.constant 1.000000e+00 : f32
      %336 = vector.broadcast %cst_144 : f32 to vector<8x128xf32>
      %337 = arith.addf %335, %336 : vector<8x128xf32>
      %cst_145 = arith.constant 5.000000e-01 : f32
      %338 = vector.broadcast %cst_145 : f32 to vector<8x128xf32>
      %339 = arith.mulf %338, %337 : vector<8x128xf32>
      %340 = arith.mulf %329, %331 : vector<8x128xf32>
      %341 = math.tanh %340 : vector<8x128xf32>
      %342 = arith.mulf %339, %341 : vector<8x128xf32>
      %c0_146 = arith.constant 0 : index
      %c0_147 = arith.constant 0 : index
      %343 = vector.load %arg8[%c0_146, %c0_147] : memref<1x128xf32, #tpu.memory_space<vmem>>, vector<1x128xf32>
      %344 = vector.broadcast %343 : vector<1x128xf32> to vector<8x128xf32>
      %345 = arith.mulf %309, %344 : vector<8x128xf32>
      %cst_148 = arith.constant dense<0.000000e+00> : vector<8xf32>
      %346 = vector.multi_reduction <add>, %345, %cst_148 [1] : vector<8x128xf32> to vector<8xf32>
      %347 = vector.shape_cast %346 : vector<8xf32> to vector<8x1xf32>
      %c0_149 = arith.constant 0 : index
      %c0_150 = arith.constant 0 : index
      %348 = vector.load %arg9[%c0_149, %c0_150] : memref<1x128xf32, #tpu.memory_space<vmem>>, vector<1x128xf32>
      %349 = vector.broadcast %348 : vector<1x128xf32> to vector<8x128xf32>
      %350 = arith.mulf %342, %349 : vector<8x128xf32>
      %cst_151 = arith.constant dense<0.000000e+00> : vector<8xf32>
      %351 = vector.multi_reduction <add>, %350, %cst_151 [1] : vector<8x128xf32> to vector<8xf32>
      %352 = vector.shape_cast %351 : vector<8xf32> to vector<8x1xf32>
      %353 = arith.addf %347, %352 : vector<8x1xf32>
      %c0_152 = arith.constant 0 : index
      %c0_153 = arith.constant 0 : index
      %354 = vector.load %arg10[%c0_152, %c0_153] : memref<1x1xf32, #tpu.memory_space<vmem>>, vector<1x1xf32>
      %355 = vector.broadcast %354 : vector<1x1xf32> to vector<8x1xf32>
      %356 = arith.addf %353, %355 : vector<8x1xf32>
      %c0_154 = arith.constant 0 : index
      %c0_155 = arith.constant 0 : index
      %357 = vector.load %arg11[%c0_154, %c0_155] : memref<8x1xf32, #tpu.memory_space<vmem>>, vector<8x1xf32>
      tpu.vector_store %arg11[%c0_154, %c0_155], %356 {strides = array<i32>} : memref<8x1xf32, #tpu.memory_space<vmem>>, vector<8x1xf32>,
    } else {
    }
    return
  }
  func.func @transform_0(%arg0: i32, %arg1: i32) -> (i32, i32, i32) {
    %c0_i32 = arith.constant 0 : i32
    %c0_i32_0 = arith.constant 0 : i32
    return %arg1, %arg0, %c0_i32 : i32, i32, i32
  }
  func.func @transform_1(%arg0: i32, %arg1: i32) -> (i32, i32) {
    %c0_i32 = arith.constant 0 : i32
    %c0_i32_0 = arith.constant 0 : i32
    %c0_i32_1 = arith.constant 0 : i32
    return %c0_i32, %c0_i32_0 : i32, i32
  }
  func.func @transform_2(%arg0: i32, %arg1: i32) -> (i32, i32) {
    %c0_i32 = arith.constant 0 : i32
    %c0_i32_0 = arith.constant 0 : i32
    %c0_i32_1 = arith.constant 0 : i32
    return %c0_i32, %c0_i32_0 : i32, i32
  }
  func.func @transform_3(%arg0: i32, %arg1: i32) -> (i32, i32) {
    %c0_i32 = arith.constant 0 : i32
    %c0_i32_0 = arith.constant 0 : i32
    %c0_i32_1 = arith.constant 0 : i32
    return %c0_i32, %c0_i32_0 : i32, i32
  }
  func.func @transform_4(%arg0: i32, %arg1: i32) -> (i32, i32) {
    %c0_i32 = arith.constant 0 : i32
    %c0_i32_0 = arith.constant 0 : i32
    %c0_i32_1 = arith.constant 0 : i32
    return %c0_i32, %c0_i32_0 : i32, i32
  }
  func.func @transform_5(%arg0: i32, %arg1: i32) -> (i32, i32) {
    %c0_i32 = arith.constant 0 : i32
    %c0_i32_0 = arith.constant 0 : i32
    %c0_i32_1 = arith.constant 0 : i32
    return %c0_i32, %c0_i32_0 : i32, i32
  }
  func.func @transform_6(%arg0: i32, %arg1: i32) -> (i32, i32) {
    %c0_i32 = arith.constant 0 : i32
    %c0_i32_0 = arith.constant 0 : i32
    %c0_i32_1 = arith.constant 0 : i32
    return %c0_i32, %c0_i32_0 : i32, i32
  }
  func.func @transform_7(%arg0: i32, %arg1: i32) -> (i32, i32) {
    %c0_i32 = arith.constant 0 : i32
    %c0_i32_0 = arith.constant 0 : i32
    %c0_i32_1 = arith.constant 0 : i32
    return %c0_i32, %c0_i32_0 : i32, i32
  }
  func.func @transform_8(%arg0: i32, %arg1: i32) -> (i32, i32) {
    %c0_i32 = arith.constant 0 : i32
    %c0_i32_0 = arith.constant 0 : i32
    %c0_i32_1 = arith.constant 0 : i32
    return %c0_i32, %c0_i32_0 : i32, i32
  }
  func.func @transform_9(%arg0: i32, %arg1: i32) -> (i32, i32) {
    %c0_i32 = arith.constant 0 : i32
    %c0_i32_0 = arith.constant 0 : i32
    return %arg0, %c0_i32 : i32, i32
  }
}

</mosaic_0001>

<bundles_post_ra>
// kernel: tpu_custom_call.1
= control target key start
LH: loop header
LB: loop body
LE: loop exit
PB: predicated region body
PF: predicated region fallthrough
CT: control target
= control target key end

     0   :  { %s3465_s0 = inlined_call_operand.hbm [shape: f32[8,8,16], index: 0, kind: input, shape index: {}]   ;;  %s3466_s1 = inlined_call_operand.hbm [shape: f32[16,512], index: 1, kind: input, shape index: {}]   ;;  %s3467_s2 = inlined_call_operand.hbm [shape: f32[16,512], index: 2, kind: input, shape index: {}]   ;;  %s3468_s3 = inlined_call_operand.vmem [shape: f32[1,512], index: 3, kind: input, shape index: {}]   ;;  %s3469_s4 = inlined_call_operand.vmem [shape: f32[1,512], index: 4, kind: input, shape index: {}]   ;;  %s3470_s5 = inlined_call_operand.hbm [shape: f32[128,512], index: 5, kind: input, shape index: {}]   ;;  %s3471_s6 = inlined_call_operand.vmem [shape: f32[1,128], index: 6, kind: input, shape index: {}]   ;;  %s3472_s7 = inlined_call_operand.vmem [shape: f32[1,128], index: 7, kind: input, shape index: {}]   ;;  %s3473_s8 = inlined_call_operand.<no memory space> [shape: f32[1,1], index: 8, kind: input, shape index: {}]   ;;  %s3474_s9 = inlined_call_operand.vmem [shape: f32[8,1], index: 9, kind: output, shape index: {}]  }
   0x1   :  { %v14_v0 = vstv %s3473_s8 }
   0x2   :  { %15 = vst [vmem:[#allocation5] sm:$0x1] %v14_v0 }
   0x3   :  { %16 = vsyncpa [#allocation7], 0 }
   0x4   :  { %17 = vsyncpa [#allocation9], 0 }
   0x5   :  { %18 = vsyncpa [#allocation12], 0  ;;  %s2864_s11 = smov [#allocation8]   ;;  %s2770_s15 = scalar_lea.hbm %s3466_s1, 1024 }
   0x6   :  { %s36_s12 = sshll.u32 %s2864_s11, 4  ;;  %p2771_p0 = scmp.ne.s32.totalorder %s3466_s1, %s2770_s15  ;;  %s37_s12 = int_to_ptr.vmem [resolvable:$true] %s36_s12 }
   0x7   :  { %p2774_p1 = scmp.lt.u32.totalorder %s2770_s15, %s3466_s1 }
   0x9   :  { %p2776_p2 = pnand %p2774_p1, %p2771_p0 }
   0xb   :  { %2779 = shalt.err (!%p2776_p2)
}
   0xc   :  { %s2780_s8 = scalar_lea.vmem %s37_s12, 1024  ;;  %p2785_p4 = scmp.lt.s32.totalorder %s37_s12, %s37_s12 }
   0xd   :  { %p2781_p3 = scmp.ne.s32.totalorder %s37_s12, %s2780_s8  ;;  %p2786_p5 = scmp.lt.s32.totalorder %s2780_s8, %s2780_s8 }
   0xf   :  { %p2787_p6 = por %p2786_p5, %p2785_p4 }
  0x11   :  { %p2788_p7 = pnand %p2787_p6, %p2781_p3 }
  0x13   :  { %2791 = shalt.err (!%p2788_p7)
}
  0x14   :  { %s2865_s20 = smov 512   ;;  %s2866_s21 = smov 32  }
  0x15   :  { %42 = dma.hbm_to_vmem [thread:$0]  %s3466_s1, 1024, %s37_s12, [#allocation9], %s2865_s20, %s2865_s20, %s2866_s21  }
  0x16   :  { %s2867_s24 = smov [#allocation6]   ;;  %s2792_s28 = scalar_lea.hbm %s3465_s0, 1024 }
  0x17   :  { %s24_s25 = sshll.u32 %s2867_s24, 4  ;;  %p2793_p8 = scmp.ne.s32.totalorder %s3465_s0, %s2792_s28  ;;  %s25_s25 = int_to_ptr.vmem [resolvable:$true] %s24_s25 }
  0x18   :  { %p2796_p9 = scmp.lt.u32.totalorder %s2792_s28, %s3465_s0 }
  0x1a   :  { %p2798_p10 = pnand %p2796_p9, %p2793_p8 }
  0x1c   :  { %2801 = shalt.err (!%p2798_p10)
}
  0x1d   :  { %s2802_s13 = scalar_lea.vmem %s25_s25, 1024  ;;  %p2807_p12 = scmp.lt.s32.totalorder %s25_s25, %s25_s25 }
  0x1e   :  { %p2803_p11 = scmp.ne.s32.totalorder %s25_s25, %s2802_s13  ;;  %p2808_p13 = scmp.lt.s32.totalorder %s2802_s13, %s2802_s13 }
  0x20   :  { %p2809_p0 = por %p2808_p13, %p2807_p12 }
  0x22   :  { %p2810_p1 = pnand %p2809_p0, %p2803_p11 }
  0x24   :  { %2813 = shalt.err (!%p2810_p1)
}
  0x25   :  { %s2868_s1 = smov 128   ;;  %s2869_s12 = smov 8  }
  0x26   :  { %30 = dma.hbm_to_vmem [thread:$0]  %s3465_s0, 1024, %s25_s25, [#allocation7], %s2868_s1, %s2868_s1, %s2869_s12  }
  0x27   :  { %s2870_s16 = smov [#allocation10]   ;;  %s2871_s18 = smov [#allocation11]  }
  0x28   :  { %s48_s17 = sshll.u32 %s2870_s16, 4  ;;  %s64_s19 = sshll.u32 %s2871_s18, 4  ;;  %s49_s17 = int_to_ptr.vmem [resolvable:$true] %s48_s17  ;;  %s2953_s19 = int_to_ptr.vmem [resolvable:$true] %s64_s19 }
  0x29   :  { %s2814_s23 = scalar_lea.hbm %s3467_s2, 1024 }
  0x2a   :  { %p2815_p2 = scmp.ne.s32.totalorder %s3467_s2, %s2814_s23  ;;  %p2818_p3 = scmp.lt.u32.totalorder %s2814_s23, %s3467_s2 }
  0x2c   :  { %p2820_p4 = pnand %p2818_p3, %p2815_p2 }
  0x2e   :  { %2823 = shalt.err (!%p2820_p4)
}
  0x2f   :  { %s2824_s0 = scalar_lea.vmem %s49_s17, 1024  ;;  %p2829_p6 = scmp.lt.s32.totalorder %s49_s17, %s49_s17 }
  0x30   :  { %p2825_p5 = scmp.ne.s32.totalorder %s49_s17, %s2824_s0  ;;  %p2830_p7 = scmp.lt.s32.totalorder %s2824_s0, %s2824_s0 }
  0x32   :  { %p2831_p8 = por %p2830_p7, %p2829_p6 }
  0x34   :  { %p2832_p9 = pnand %p2831_p8, %p2825_p5 }
  0x36   :  { %2835 = shalt.err (!%p2832_p9)
}
  0x37   :  { %54 = dma.hbm_to_vmem [thread:$0]  %s3467_s2, 1024, %s49_s17, [#allocation9], %s2865_s20, %s2865_s20, %s2866_s21  }
  0x38   :  { %s2836_s11 = scalar_lea.hbm %s3470_s5, 8192 }
  0x39   :  { %p2837_p10 = scmp.ne.s32.totalorder %s3470_s5, %s2836_s11  ;;  %p2840_p11 = scmp.lt.u32.totalorder %s2836_s11, %s3470_s5 }
  0x3b   :  { %p2842_p12 = pnand %p2840_p11, %p2837_p10 }
  0x3d   :  { %2845 = shalt.err (!%p2842_p12)
}
  0x3e   :  { %s2846_s15 = scalar_lea.vmem %s2953_s19, 8192  ;;  %p2851_p0 = scmp.lt.s32.totalorder %s2953_s19, %s2953_s19 }
  0x3f   :  { %p2847_p13 = scmp.ne.s32.totalorder %s2953_s19, %s2846_s15  ;;  %p2852_p1 = scmp.lt.s32.totalorder %s2846_s15, %s2846_s15 }
  0x41   :  { %p2853_p2 = por %p2852_p1, %p2851_p0 }
  0x43   :  { %p2854_p3 = pnand %p2853_p2, %p2847_p13 }
  0x45   :  { %2857 = shalt.err (!%p2854_p3)
}
  0x46   :  { %70 = dma.hbm_to_vmem [thread:$0]  %s3470_s5, 8192, %s2953_s19, [#allocation12], %s2865_s20, %s2865_s20, %s2866_s21  }
  0x47   :  { %2858 = dma.done.wait [#allocation7], 1024  }
  0x48   :  { %2859 = vsyncadd [#allocation7], 4294966272 }
  0x49   :  { %2860 = dma.done.wait [#allocation9], 2048  }
  0x4a   :  { %2861 = vsyncadd [#allocation9], 4294965248 }
  0x4b   :  { %2862 = dma.done.wait [#allocation12], 8192  }
  0x4c   :  { %2863 = vsyncadd [#allocation12], 4294959104  ;;  %v2872_v1 = vmov 0.0   ;;  %v104_v2 = vld [vmem:[#allocation8 + $0x8] sm:$0xff]  ;;  %v106_v4 = vld [vmem:[#allocation8 + $0x18] sm:$0xff]  ;;  %vm133_vm0 = vcmask 130048  }
  0x4d   :  { %222 = vmatprep.mubr.f32.mxu0 %v2872_v1  ;;  %335 = vmatprep.mubr.f32.mxu1 %v2872_v1  ;;  %v108_v3 = vld [vmem:[#allocation8 + $0x28] sm:$0xff]  ;;  %v110_v6 = vld [vmem:[#allocation8 + $0x38] sm:$0xff]  ;;  %v103_v7 = vld [vmem:[#allocation8] sm:$0xff]  ;;  %vm2050_vm1 = vcmask 7168  }
  0x4e   :  { %v2080_v5 = vpack.c.bf16 %v108_v3, %v104_v2  ;;  %v107_v8 = vld [vmem:[#allocation8 + $0x20] sm:$0xff]  ;;  %v2084_v9 = vpack.c.bf16 %v110_v6, %v106_v4  ;;  %v105_v11 = vld [vmem:[#allocation8 + $0x10] sm:$0xff]  ;;  %v423_v15 = vld [vmem:[#allocation11 + $0x8] sm:$0xff] }
  0x4f   :  { %v2082_v10 = vpack.c.bf16 %v107_v8, %v103_v7  ;;  %v109_v12 = vld [vmem:[#allocation8 + $0x30] sm:$0xff]  ;;  %v95_v13 = vld [vmem:[#allocation6] sm:$0xff]  ;;  %v427_v16 = vld [vmem:[#allocation11 + $0x28] sm:$0xff] }
  0x50   :  { %2081 = vmatprep.subr.bf16.mxu0 %v2080_v5  ;;  %v2086_v14 = vpack.c.bf16 %v109_v12, %v105_v11  ;;  %v425_v17 = vld [vmem:[#allocation11 + $0x18] sm:$0xff]  ;;  %2085 = vmatprep.subr.bf16.mxu1 %v2084_v9  ;;  %v2992_v18 = vpack.c.bf16 %v427_v16, %v423_v15  ;;  %v422_v20 = vld [vmem:[#allocation11] sm:$0xff]  ;;  %v424_v24 = vld [vmem:[#allocation11 + $0x10] sm:$0xff] }
  0x51   :  { %2083 = vmatpush1.bf16.msra.mxu0 %v2082_v10  ;;  %v429_v19 = vld [vmem:[#allocation11 + $0x38] sm:$0xff]  ;;  %v426_v21 = vld [vmem:[#allocation11 + $0x20] sm:$0xff]  ;;  %v428_v25 = vld [vmem:[#allocation11 + $0x30] sm:$0xff] }
  0x52   :  { %2087 = vmatpush1.bf16.msra.mxu1 %v2086_v14  ;;  %v2994_v22 = vpack.c.bf16 %v429_v19, %v425_v17  ;;  %v2996_v23 = vpack.c.bf16 %v426_v21, %v422_v20  ;;  %2089 = vmatprep.subr.bf16.mxu0 %v2992_v18  ;;  %v2999_v26 = vpack.c.bf16 %v428_v25, %v424_v24  ;;  %v431_v27 = vld [vmem:[#allocation11 + $0x48] sm:$0xff]  ;;  %v433_v29 = vld [vmem:[#allocation11 + $0x58] sm:$0xff]  ;;  %v430_v32 = vld [vmem:[#allocation11 + $0x40] sm:$0xff] }
  0x53   :  { %v435_v28 = vld [vmem:[#allocation11 + $0x68] sm:$0xff]  ;;  %v437_v31 = vld [vmem:[#allocation11 + $0x78] sm:$0xff]  ;;  %v434_v33 = vld [vmem:[#allocation11 + $0x60] sm:$0xff] }
  0x54   :  { %2059 = vmatmul.mubr.msk.f32.vlgmr.msra.gmra.mrb[0].mxu0 %vm133_vm0, %v95_v13  ;;  %2121 = vmatprep.subr.bf16.mxu1 %v2994_v22  ;;  %v3003_v30 = vpack.c.bf16 %v435_v28, %v431_v27  ;;  %v96_v34 = vld [vmem:[#allocation6 + $0x8] sm:$0xff]  ;;  %v3007_v35 = vpack.c.bf16 %v437_v31, %v433_v29  ;;  %v3009_v36 = vpack.c.bf16 %v434_v33, %v430_v32  ;;  %v432_v37 = vld [vmem:[#allocation11 + $0x50] sm:$0xff]  ;;  %v441_v42 = vld [vmem:[#allocation11 + $0x98] sm:$0xff] }
  0x55   :  { %2067 = vmatmul.mubr.msk.f32.vlgmr.msra.gmra.mrb[0].mxu1 %vm133_vm0, %v95_v13  ;;  %2091 = vmatpush1.bf16.msra.mxu0 %v2996_v23  ;;  %v436_v38 = vld [vmem:[#allocation11 + $0x70] sm:$0xff]  ;;  %v439_v40 = vld [vmem:[#allocation11 + $0x88] sm:$0xff]  ;;  %v445_v44 = vld [vmem:[#allocation11 + $0xb8] sm:$0xff] }
  0x56   :  { %2123 = vmatpush1.bf16.msra.mxu1 %v2999_v26  ;;  %228 = vmatprep.mubr.f32.mxu0 %v2872_v1  ;;  %v3013_v39 = vpack.c.bf16 %v436_v38, %v432_v37  ;;  %v443_v41 = vld [vmem:[#allocation11 + $0xa8] sm:$0xff]  ;;  %v438_v45 = vld [vmem:[#allocation11 + $0x80] sm:$0xff]  ;;  %v97_v47 = vld [vmem:[#allocation6 + $0x10] sm:$0xff]  ;;  %v3021_v48 = vpack.c.bf16 %v445_v44, %v441_v42 }
  0x57   :  { %341 = vmatprep.mubr.f32.mxu1 %v2872_v1  ;;  %2093 = vmatprep.subr.bf16.mxu0 %v3003_v30  ;;  %v3017_v43 = vpack.c.bf16 %v443_v41, %v439_v40  ;;  %v442_v46 = vld [vmem:[#allocation11 + $0xa0] sm:$0xff]  ;;  %v440_v49 = vld [vmem:[#allocation11 + $0x90] sm:$0xff]  ;;  %v447_v52 = vld [vmem:[#allocation11 + $0xc8] sm:$0xff] }
  0x58   :  { %2060 = vmatmul.mubr.msk.f32.gmra.mrb[2].mxu0 %vm133_vm0, %v96_v34  ;;  %2125 = vmatprep.subr.bf16.mxu1 %v3007_v35  ;;  %v444_v50 = vld [vmem:[#allocation11 + $0xb0] sm:$0xff]  ;;  %v3025_v51 = vpack.c.bf16 %v442_v46, %v438_v45  ;;  %v451_v53 = vld [vmem:[#allocation11 + $0xe8] sm:$0xff]  ;;  %v449_v54 = vld [vmem:[#allocation11 + $0xd8] sm:$0xff] }
  0x59   :  { %2068 = vmatmul.mubr.msk.f32.gmra.mrb[2].mxu1 %vm133_vm0, %v96_v34  ;;  %2095 = vmatpush1.bf16.msra.mxu0 %v3009_v36  ;;  %v3029_v55 = vpack.c.bf16 %v444_v50, %v440_v49  ;;  %v453_v56 = vld [vmem:[#allocation11 + $0xf8] sm:$0xff]  ;;  %v446_v57 = vld [vmem:[#allocation11 + $0xc0] sm:$0xff]  ;;  %v3033_v59 = vpack.c.bf16 %v451_v53, %v447_v52  ;;  %v448_v60 = vld [vmem:[#allocation11 + $0xd0] sm:$0xff] }
  0x5a   :  { %2127 = vmatpush1.bf16.msra.mxu1 %v3013_v39  ;;  %234 = vmatprep.mubr.f32.mxu0 %v2872_v1  ;;  %v450_v58 = vld [vmem:[#allocation11 + $0xe0] sm:$0xff]  ;;  %v452_v61 = vld [vmem:[#allocation11 + $0xf0] sm:$0xff]  ;;  %v3037_v62 = vpack.c.bf16 %v453_v56, %v449_v54  ;;  %v455_v63 = vld [vmem:[#allocation11 + $0x108] sm:$0xff] }
  0x5b   :  { %347 = vmatprep.mubr.f32.mxu1 %v2872_v1  ;;  %2097 = vmatprep.subr.bf16.mxu0 %v3017_v43  ;;  %v459_v0 = vld [vmem:[#allocation11 + $0x128] sm:$0xff]  ;;  %v98_v2 = vld [vmem:[#allocation6 + $0x18] sm:$0xff]  ;;  %v3041_v3 = vpack.c.bf16 %v450_v58, %v446_v57  ;;  %v3045_v6 = vpack.c.bf16 %v452_v61, %v448_v60  ;;  %v454_v7 = vld [vmem:[#allocation11 + $0x100] sm:$0xff] }
  0x5c   :  { %2061 = vmatmul.mubr.msk.f32.gmra.mrb[4].mxu0 %vm133_vm0, %v97_v47  ;;  %2129 = vmatprep.subr.bf16.mxu1 %v3021_v48  ;;  %v457_v4 = vld [vmem:[#allocation11 + $0x118] sm:$0xff]  ;;  %v458_v8 = vld [vmem:[#allocation11 + $0x120] sm:$0xff]  ;;  %v3049_v9 = vpack.c.bf16 %v459_v0, %v455_v63  ;;  %v456_v10 = vld [vmem:[#allocation11 + $0x110] sm:$0xff] }
  0x5d   :  { %2069 = vmatmul.mubr.msk.f32.gmra.mrb[4].mxu1 %vm133_vm0, %v97_v47  ;;  %2099 = vmatpush1.bf16.msra.mxu0 %v3025_v51  ;;  %v461_v5 = vld [vmem:[#allocation11 + $0x138] sm:$0xff]  ;;  %v460_v11 = vld [vmem:[#allocation11 + $0x130] sm:$0xff]  ;;  %v463_v13 = vld [vmem:[#allocation11 + $0x148] sm:$0xff]  ;;  %v3057_v16 = vpack.c.bf16 %v458_v8, %v454_v7  ;;  %v113_v8 = vlaneseq }
  0x5e   :  { %2131 = vmatpush1.bf16.msra.mxu1 %v3029_v55  ;;  %240 = vmatprep.mubr.f32.mxu0 %v2872_v1  ;;  %v3053_v12 = vpack.c.bf16 %v461_v5, %v457_v4  ;;  %v467_v14 = vld [vmem:[#allocation11 + $0x168] sm:$0xff]  ;;  %v99_v15 = vld [vmem:[#allocation6 + $0x20] sm:$0xff]  ;;  %v465_v17 = vld [vmem:[#allocation11 + $0x158] sm:$0xff]  ;;  %v3061_v20 = vpack.c.bf16 %v460_v11, %v456_v10 }
  0x5f   :  { %353 = vmatprep.mubr.f32.mxu1 %v2872_v1  ;;  %2101 = vmatprep.subr.bf16.mxu0 %v3033_v59  ;;  %v469_v19 = vld [vmem:[#allocation11 + $0x178] sm:$0xff]  ;;  %v462_v21 = vld [vmem:[#allocation11 + $0x140] sm:$0xff]  ;;  %v3065_v25 = vpack.c.bf16 %v467_v14, %v463_v13  ;;  %v464_v27 = vld [vmem:[#allocation11 + $0x150] sm:$0xff]  ;;  %v3158_v10 = vshrl.u32 %v113_v8, 7 }
  0x60   :  { %2062 = vmatmul.mubr.msk.f32.gmra.mrb[6].mxu0 %vm133_vm0, %v98_v2  ;;  %2133 = vmatprep.subr.bf16.mxu1 %v3037_v62  ;;  %v466_v24 = vld [vmem:[#allocation11 + $0x160] sm:$0xff]  ;;  %v468_v28 = vld [vmem:[#allocation11 + $0x170] sm:$0xff]  ;;  %v3069_v29 = vpack.c.bf16 %v469_v19, %v465_v17  ;;  %v471_v31 = vld [vmem:[#allocation11 + $0x188] sm:$0xff] }
  0x61   :  { %2070 = vmatmul.mubr.msk.f32.gmra.mrb[6].mxu1 %vm133_vm0, %v98_v2  ;;  %2103 = vmatpush1.bf16.msra.mxu0 %v3041_v3  ;;  %v475_v32 = vld [vmem:[#allocation11 + $0x1a8] sm:$0xff]  ;;  %v3073_v34 = vpack.c.bf16 %v466_v24, %v462_v21  ;;  %v473_v37 = vld [vmem:[#allocation11 + $0x198] sm:$0xff]  ;;  %v3077_v40 = vpack.c.bf16 %v468_v28, %v464_v27  ;;  %v470_v41 = vld [vmem:[#allocation11 + $0x180] sm:$0xff]  ;;  %v115_v11 = vsub.s32 0, %v3158_v10  ;;  %v119_v14 = vsub.s32 1, %v3158_v10 }
  0x62   :  { %2135 = vmatpush1.bf16.msra.mxu1 %v3045_v6  ;;  %246 = vmatprep.mubr.f32.mxu0 %v2872_v1  ;;  %v100_v33 = vld [vmem:[#allocation6 + $0x28] sm:$0xff]  ;;  %v477_v38 = vld [vmem:[#allocation11 + $0x1b8] sm:$0xff]  ;;  %v474_v42 = vld [vmem:[#allocation11 + $0x1a0] sm:$0xff]  ;;  %v3081_v44 = vpack.c.bf16 %v475_v32, %v471_v31  ;;  %v123_v17 = vsub.s32 2, %v3158_v10  ;;  %v127_v32 = vsub.s32 3, %v3158_v10 }
  0x63   :  { %359 = vmatprep.mubr.f32.mxu1 %v2872_v1  ;;  %2105 = vmatprep.subr.bf16.mxu0 %v3049_v9  ;;  %v472_v45 = vld [vmem:[#allocation11 + $0x190] sm:$0xff]  ;;  %v3085_v47 = vpack.c.bf16 %v477_v38, %v473_v37  ;;  %v479_v49 = vld [vmem:[#allocation11 + $0x1c8] sm:$0xff]  ;;  %v3089_v53 = vpack.c.bf16 %v474_v42, %v470_v41  ;;  %v481_v54 = vld [vmem:[#allocation11 + $0x1d8] sm:$0xff] }
  0x64   :  { %2063 = vmatmul.mubr.msk.f32.gmra.mrb[8].mxu0 %vm133_vm0, %v99_v15  ;;  %2137 = vmatprep.subr.bf16.mxu1 %v3053_v12  ;;  %v476_v46 = vld [vmem:[#allocation11 + $0x1b0] sm:$0xff]  ;;  %v483_v50 = vld [vmem:[#allocation11 + $0x1e8] sm:$0xff]  ;;  %v485_v56 = vld [vmem:[#allocation11 + $0x1f8] sm:$0xff] }
  0x65   :  { %2071 = vmatmul.mubr.msk.f32.gmra.mrb[8].mxu1 %vm133_vm0, %v99_v15  ;;  %2107 = vmatpush1.bf16.msra.mxu0 %v3057_v16  ;;  %v101_v52 = vld [vmem:[#allocation6 + $0x30] sm:$0xff]  ;;  %v3093_v57 = vpack.c.bf16 %v476_v46, %v472_v45  ;;  %v478_v58 = vld [vmem:[#allocation11 + $0x1c0] sm:$0xff]  ;;  %v3097_v61 = vpack.c.bf16 %v483_v50, %v479_v49  ;;  %v3101_v2 = vpack.c.bf16 %v485_v56, %v481_v54  ;;  %v102_v4 = vld [vmem:[#allocation6 + $0x38] sm:$0xff] }
  0x66   :  { %2139 = vmatpush1.bf16.msra.mxu1 %v3061_v20  ;;  %252 = vmatprep.mubr.f32.mxu0 %v2872_v1  ;;  %v482_v60 = vld [vmem:[#allocation11 + $0x1e0] sm:$0xff]  ;;  %v480_v63 = vld [vmem:[#allocation11 + $0x1d0] sm:$0xff] }
  0x67   :  { %365 = vmatprep.mubr.f32.mxu1 %v2872_v1  ;;  %2109 = vmatprep.subr.bf16.mxu0 %v3065_v25  ;;  %v484_v0 = vld [vmem:[#allocation11 + $0x1f0] sm:$0xff]  ;;  %v3105_v5 = vpack.c.bf16 %v482_v60, %v478_v58  ;;  %v111_v13 = vld [vmem:[%s3468_s3] sm:$0xf] }
  0x68   :  { %2064 = vmatmul.mubr.msk.f32.gmra.mrb[10].mxu0 %vm133_vm0, %v100_v33  ;;  %2141 = vmatprep.subr.bf16.mxu1 %v3069_v29  ;;  %v3109_v7 = vpack.c.bf16 %v484_v0, %v480_v63  ;;  %v3167_v15 = vrot.slane %v111_v13, %v115_v11  ;;  %v3170_v19 = vrot.slane %v111_v13, %v119_v14 }
  0x69   :  { %2072 = vmatmul.mubr.msk.f32.gmra.mrb[10].mxu1 %vm133_vm0, %v100_v33  ;;  %2111 = vmatpush1.bf16.msra.mxu0 %v3073_v34  ;;  %v3175_v27 = vrot.slane %v111_v13, %v123_v17  ;;  %v3182_v45 = vrot.slane %v111_v13, %v127_v32 }
  0x6a   :  { %2143 = vmatpush1.bf16.msra.mxu1 %v3077_v40  ;;  %258 = vmatprep.mubr.f32.mxu0 %v2872_v1 }
  0x6b   :  { %371 = vmatprep.mubr.f32.mxu1 %v2872_v1  ;;  %2113 = vmatprep.subr.bf16.mxu0 %v3081_v44 }
  0x6c   :  { %2065 = vmatmul.mubr.msk.f32.gmra.mrb[12].mxu0 %vm133_vm0, %v101_v52  ;;  %2145 = vmatprep.subr.bf16.mxu1 %v3085_v47 }
  0x6d   :  { %2073 = vmatmul.mubr.msk.f32.gmra.mrb[12].mxu1 %vm133_vm0, %v101_v52  ;;  %2115 = vmatpush1.bf16.msra.mxu0 %v3089_v53 }
  0x6e   :  { %2147 = vmatpush1.bf16.msra.mxu1 %v3093_v57  ;;  %264 = vmatprep.mubr.f32.mxu0 %v2872_v1 }
  0x6f   :  { %377 = vmatprep.mubr.f32.mxu1 %v2872_v1  ;;  %2117 = vmatprep.subr.bf16.mxu0 %v3097_v61 }
  0x70   :  { %2066 = vmatmul.mubr.msk.f32.gmra.mrb[14].mxu0 %vm133_vm0, %v102_v4  ;;  %2149 = vmatprep.subr.bf16.mxu1 %v3101_v2 }
  0x71   :  { %2074 = vmatmul.mubr.msk.f32.gmra.mrb[14].mxu1 %vm133_vm0, %v102_v4  ;;  %2119 = vmatpush1.bf16.msra.mxu0 %v3105_v5 }
  0x72   :  { %2151 = vmatpush1.bf16.msra.mxu1 %v3109_v7  ;;  %550 = vmatprep.mubr.f32.mxu0 %v2872_v1 }
  0x73   :  { %621 = vmatprep.mubr.f32.mxu1 %v2872_v1  ;;  %2153 = vmatprep.subr.bf16.mxu0 %v2992_v18 }
  0x74   :  { %551 = vmatmul.mubr.f32.vlgmr.msra.gmra.mrb[0].mxu0 %v2872_v1  ;;  %2185 = vmatprep.subr.bf16.mxu1 %v2994_v22 }
  0x75   :  { %622 = vmatmul.mubr.f32.vlgmr.msra.gmra.mrb[0].mxu1 %v2872_v1  ;;  %2155 = vmatpush1.bf16.msra.mxu0 %v2996_v23 }
  0x76   :  { %2187 = vmatpush1.bf16.msra.mxu1 %v2999_v26  ;;  %2157 = vmatprep.subr.bf16.mxu0 %v3003_v30 }
  0x77   :  { %2189 = vmatprep.subr.bf16.mxu1 %v3007_v35  ;;  %719 = vmatprep.mubr.f32.mxu0 %v2872_v1 }
  0x78   :  { %790 = vmatprep.mubr.f32.mxu1 %v2872_v1 }
  0x79   :  { %2159 = vmatpush1.bf16.msra.mxu0 %v3009_v36 }
  0x7a   :  { %2191 = vmatpush1.bf16.msra.mxu1 %v3013_v39  ;;  %2161 = vmatprep.subr.bf16.mxu0 %v3017_v43 }
  0x7b   :  { %2193 = vmatprep.subr.bf16.mxu1 %v3021_v48 }
  0x7d   :  { %2163 = vmatpush1.bf16.msra.mxu0 %v3025_v51 }
  0x7e   :  { %2195 = vmatpush1.bf16.msra.mxu1 %v3029_v55  ;;  %2165 = vmatprep.subr.bf16.mxu0 %v3033_v59 }
  0x7f   :  { %2197 = vmatprep.subr.bf16.mxu1 %v3037_v62 }
  0x81   :  { %2167 = vmatpush1.bf16.msra.mxu0 %v3041_v3 }
  0x82   :  { %2199 = vmatpush1.bf16.msra.mxu1 %v3045_v6  ;;  %2169 = vmatprep.subr.bf16.mxu0 %v3049_v9 }
  0x83   :  { %2201 = vmatprep.subr.bf16.mxu1 %v3053_v12 }
  0x85   :  { %2171 = vmatpush1.bf16.msra.mxu0 %v3057_v16 }
  0x86   :  { %2203 = vmatpush1.bf16.msra.mxu1 %v3061_v20  ;;  %2173 = vmatprep.subr.bf16.mxu0 %v3065_v25 }
  0x87   :  { %2205 = vmatprep.subr.bf16.mxu1 %v3069_v29 }
  0x89   :  { %2175 = vmatpush1.bf16.msra.mxu0 %v3073_v34 }
  0x8a   :  { %2207 = vmatpush1.bf16.msra.mxu1 %v3077_v40  ;;  %2177 = vmatprep.subr.bf16.mxu0 %v3081_v44 }
  0x8b   :  { %2209 = vmatprep.subr.bf16.mxu1 %v3085_v47 }
  0x8d   :  { %2179 = vmatpush1.bf16.msra.mxu0 %v3089_v53 }
  0x8e   :  { %2211 = vmatpush1.bf16.msra.mxu1 %v3093_v57  ;;  %2181 = vmatprep.subr.bf16.mxu0 %v3097_v61 }
  0x8f   :  { %2213 = vmatprep.subr.bf16.mxu1 %v3101_v2 }
  0x91   :  { %2183 = vmatpush1.bf16.msra.mxu0 %v3105_v5 }
  0x92   :  { %2215 = vmatpush1.bf16.msra.mxu1 %v3109_v7  ;;  %2217 = vmatprep.subr.bf16.mxu0 %v2992_v18 }
  0x93   :  { %2249 = vmatprep.subr.bf16.mxu1 %v2994_v22 }
 0x147   :  { %v552_v21 = vpop.f32.mrb[0].mxu0 }
 0x148   :  { %v2608_v24 = vadd.f32 %v552_v21, %v3167_v15  ;;  %v623_v28 = vpop.f32.mrb[0].mxu1  ;;  %v554_v31 = vpop.f32.mrb[1].mxu0 }
 0x149   :  { %v2609_v33 = vadd.f32 %v554_v31, %v3170_v19  ;;  %v625_v37 = vpop.f32.mrb[1].mxu1  ;;  %v2624_v42 = vadd.f32 %v623_v28, %v3175_v27 }
 0x14a   :  { %v632_v38 = vmul.f32 0.5, %v2608_v24  ;;  %v2625_v46 = vadd.f32 %v625_v37, %v3182_v45 }
 0x14b   :  { %v636_v41 = vmul.f32 0.5, %v2609_v33 }
 0x14c   :  { %2681 = vtanh.f32 %v632_v38  ;;  %v641_v49 = vmul.f32 0.5, %v2625_v46 }
 0x14d   :  { %2683 = vtanh.f32 %v636_v41 }
 0x14e   :  { %2685 = vtanh.f32 %v2624_v42 }
 0x14f   :  { %2687 = vtanh.f32 %v641_v49 }
 0x156   :  { %v2682_v50 = vpop.eup %2681 }
 0x157   :  { %v2684_v52 = vpop.eup %2683  ;;  %v634_v54 = vadd.f32 1.0, %v2682_v50 }
 0x158   :  { %v638_v56 = vadd.f32 1.0, %v2684_v52  ;;  %v2686_v60 = vpop.eup %2685 }
 0x159   :  { %v635_v58 = vmul.f32 0.5, %v634_v54  ;;  %v2688_v13 = vpop.eup %2687 }
 0x15a   :  { %v639_v63 = vmul.f32 0.5, %v638_v56  ;;  %v643_v14 = vadd.f32 1.0, %v2688_v13 }
 0x15b   :  { %v646_v0 = vmul.f32 %v2686_v60, %v635_v58 }
 0x15c   :  { %v645_v4 = vmul.f32 0.0, %v639_v63  ;;  %v644_v21 = vmul.f32 0.5, %v643_v14 }
 0x15e   :  { %v3185_v8 = vadd.f32 %v646_v0, %v645_v4 }
 0x160   :  { %2689 = vtanh.f32 %v3185_v8 }
 0x16a   :  { %v2690_v24 = vpop.eup %2689 }
 0x16b   :  { %v649_v28 = vmul.f32 %v2690_v24, %v644_v21 }
 0x16d   :  { %720 = vmatmul.mubr.f32.vlgmr.msra.gmra.mrb[2].mxu0 %v649_v28  ;;  %791 = vmatmul.mubr.f32.vlgmr.msra.gmra.mrb[2].mxu1 %v649_v28 }
 0x16e   :  { %2219 = vmatpush1.bf16.msra.mxu0 %v2996_v23  ;;  %2251 = vmatpush1.bf16.msra.mxu1 %v2999_v26 }
 0x16f   :  { %2221 = vmatprep.subr.bf16.mxu0 %v3003_v30  ;;  %2253 = vmatprep.subr.bf16.mxu1 %v3007_v35 }
 0x170   :  { %888 = vmatprep.mubr.f32.mxu0 %v2872_v1  ;;  %959 = vmatprep.mubr.f32.mxu1 %v2872_v1 }
 0x172   :  { %2223 = vmatpush1.bf16.msra.mxu0 %v3009_v36  ;;  %2255 = vmatpush1.bf16.msra.mxu1 %v3013_v39 }
 0x173   :  { %2225 = vmatprep.subr.bf16.mxu0 %v3017_v43  ;;  %2257 = vmatprep.subr.bf16.mxu1 %v3021_v48 }
 0x176   :  { %2227 = vmatpush1.bf16.msra.mxu0 %v3025_v51  ;;  %2259 = vmatpush1.bf16.msra.mxu1 %v3029_v55 }
 0x177   :  { %2229 = vmatprep.subr.bf16.mxu0 %v3033_v59  ;;  %2261 = vmatprep.subr.bf16.mxu1 %v3037_v62 }
 0x17a   :  { %2231 = vmatpush1.bf16.msra.mxu0 %v3041_v3  ;;  %2263 = vmatpush1.bf16.msra.mxu1 %v3045_v6 }
 0x17b   :  { %2233 = vmatprep.subr.bf16.mxu0 %v3049_v9  ;;  %2265 = vmatprep.subr.bf16.mxu1 %v3053_v12 }
 0x17e   :  { %2235 = vmatpush1.bf16.msra.mxu0 %v3057_v16  ;;  %2267 = vmatpush1.bf16.msra.mxu1 %v3061_v20 }
 0x17f   :  { %2237 = vmatprep.subr.bf16.mxu0 %v3065_v25  ;;  %2269 = vmatprep.subr.bf16.mxu1 %v3069_v29 }
 0x182   :  { %2239 = vmatpush1.bf16.msra.mxu0 %v3073_v34  ;;  %2271 = vmatpush1.bf16.msra.mxu1 %v3077_v40 }
 0x183   :  { %2241 = vmatprep.subr.bf16.mxu0 %v3081_v44  ;;  %2273 = vmatprep.subr.bf16.mxu1 %v3085_v47 }
 0x186   :  { %2243 = vmatpush1.bf16.msra.mxu0 %v3089_v53  ;;  %2275 = vmatpush1.bf16.msra.mxu1 %v3093_v57 }
 0x187   :  { %2245 = vmatprep.subr.bf16.mxu0 %v3097_v61  ;;  %2277 = vmatprep.subr.bf16.mxu1 %v3101_v2 }
 0x18a   :  { %2247 = vmatpush1.bf16.msra.mxu0 %v3105_v5  ;;  %2279 = vmatpush1.bf16.msra.mxu1 %v3109_v7 }
 0x18b   :  { %2281 = vmatprep.subr.bf16.mxu0 %v2992_v18  ;;  %2313 = vmatprep.subr.bf16.mxu1 %v2994_v22 }
 0x240   :  { %v721_v31 = vpop.f32.mrb[2].mxu0  ;;  %v792_v33 = vpop.f32.mrb[2].mxu1 }
 0x241   :  { %v2610_v37 = vadd.f32 %v721_v31, %v3167_v15  ;;  %v723_v38 = vpop.f32.mrb[3].mxu0  ;;  %v794_v41 = vpop.f32.mrb[3].mxu1  ;;  %v2626_v50 = vadd.f32 %v792_v33, %v3175_v27 }
 0x242   :  { %v2611_v42 = vadd.f32 %v723_v38, %v3170_v19  ;;  %v2627_v52 = vadd.f32 %v794_v41, %v3182_v45 }
 0x243   :  { %v801_v46 = vmul.f32 0.5, %v2610_v37 }
 0x244   :  { %v805_v49 = vmul.f32 0.5, %v2611_v42  ;;  %v810_v54 = vmul.f32 0.5, %v2627_v52 }
 0x245   :  { %2691 = vtanh.f32 %v801_v46 }
 0x246   :  { %2693 = vtanh.f32 %v805_v49 }
 0x247   :  { %2695 = vtanh.f32 %v2626_v50 }
 0x248   :  { %2697 = vtanh.f32 %v810_v54 }
 0x24f   :  { %v2692_v56 = vpop.eup %2691 }
 0x250   :  { %v2694_v58 = vpop.eup %2693  ;;  %v803_v60 = vadd.f32 1.0, %v2692_v56 }
 0x251   :  { %v807_v63 = vadd.f32 1.0, %v2694_v58  ;;  %v2696_v4 = vpop.eup %2695 }
 0x252   :  { %v804_v0 = vmul.f32 0.5, %v803_v60  ;;  %v2698_v28 = vpop.eup %2697 }
 0x253   :  { %v808_v13 = vmul.f32 0.5, %v807_v63  ;;  %v812_v31 = vadd.f32 1.0, %v2698_v28 }
 0x254   :  { %v815_v14 = vmul.f32 %v2696_v4, %v804_v0 }
 0x255   :  { %v814_v21 = vmul.f32 %v808_v13, %v3185_v8  ;;  %v813_v33 = vmul.f32 0.5, %v812_v31 }
 0x257   :  { %v3227_v24 = vadd.f32 %v815_v14, %v814_v21 }
 0x259   :  { %2699 = vtanh.f32 %v3227_v24 }
 0x263   :  { %v2700_v37 = vpop.eup %2699 }
 0x264   :  { %v818_v38 = vmul.f32 %v2700_v37, %v813_v33 }
 0x266   :  { %889 = vmatmul.mubr.f32.vlgmr.msra.gmra.mrb[4].mxu0 %v818_v38  ;;  %960 = vmatmul.mubr.f32.vlgmr.msra.gmra.mrb[4].mxu1 %v818_v38 }
 0x267   :  { %2283 = vmatpush1.bf16.msra.mxu0 %v2996_v23  ;;  %2315 = vmatpush1.bf16.msra.mxu1 %v2999_v26 }
 0x268   :  { %2285 = vmatprep.subr.bf16.mxu0 %v3003_v30  ;;  %2317 = vmatprep.subr.bf16.mxu1 %v3007_v35 }
 0x269   :  { %1057 = vmatprep.mubr.f32.mxu0 %v2872_v1  ;;  %1128 = vmatprep.mubr.f32.mxu1 %v2872_v1 }
 0x26b   :  { %2287 = vmatpush1.bf16.msra.mxu0 %v3009_v36  ;;  %2319 = vmatpush1.bf16.msra.mxu1 %v3013_v39 }
 0x26c   :  { %2289 = vmatprep.subr.bf16.mxu0 %v3017_v43  ;;  %2321 = vmatprep.subr.bf16.mxu1 %v3021_v48 }
 0x26f   :  { %2291 = vmatpush1.bf16.msra.mxu0 %v3025_v51  ;;  %2323 = vmatpush1.bf16.msra.mxu1 %v3029_v55 }
 0x270   :  { %2293 = vmatprep.subr.bf16.mxu0 %v3033_v59  ;;  %2325 = vmatprep.subr.bf16.mxu1 %v3037_v62 }
 0x273   :  { %2295 = vmatpush1.bf16.msra.mxu0 %v3041_v3  ;;  %2327 = vmatpush1.bf16.msra.mxu1 %v3045_v6 }
 0x274   :  { %2297 = vmatprep.subr.bf16.mxu0 %v3049_v9  ;;  %2329 = vmatprep.subr.bf16.mxu1 %v3053_v12 }
 0x277   :  { %2299 = vmatpush1.bf16.msra.mxu0 %v3057_v16  ;;  %2331 = vmatpush1.bf16.msra.mxu1 %v3061_v20 }
 0x278   :  { %2301 = vmatprep.subr.bf16.mxu0 %v3065_v25  ;;  %2333 = vmatprep.subr.bf16.mxu1 %v3069_v29 }
 0x27b   :  { %2303 = vmatpush1.bf16.msra.mxu0 %v3073_v34  ;;  %2335 = vmatpush1.bf16.msra.mxu1 %v3077_v40 }
 0x27c   :  { %2305 = vmatprep.subr.bf16.mxu0 %v3081_v44  ;;  %2337 = vmatprep.subr.bf16.mxu1 %v3085_v47 }
 0x27f   :  { %2307 = vmatpush1.bf16.msra.mxu0 %v3089_v53  ;;  %2339 = vmatpush1.bf16.msra.mxu1 %v3093_v57 }
 0x280   :  { %2309 = vmatprep.subr.bf16.mxu0 %v3097_v61  ;;  %2341 = vmatprep.subr.bf16.mxu1 %v3101_v2 }
 0x283   :  { %2311 = vmatpush1.bf16.msra.mxu0 %v3105_v5  ;;  %2343 = vmatpush1.bf16.msra.mxu1 %v3109_v7 }
 0x284   :  { %2345 = vmatprep.subr.bf16.mxu0 %v2992_v18  ;;  %2377 = vmatprep.subr.bf16.mxu1 %v2994_v22 }
 0x339   :  { %v890_v8 = vpop.f32.mrb[4].mxu0  ;;  %v961_v41 = vpop.f32.mrb[4].mxu1 }
 0x33a   :  { %v2612_v42 = vadd.f32 %v890_v8, %v3167_v15  ;;  %v892_v46 = vpop.f32.mrb[5].mxu0  ;;  %v963_v49 = vpop.f32.mrb[5].mxu1  ;;  %v2628_v56 = vadd.f32 %v961_v41, %v3175_v27 }
 0x33b   :  { %v2613_v50 = vadd.f32 %v892_v46, %v3170_v19  ;;  %v2629_v58 = vadd.f32 %v963_v49, %v3182_v45 }
 0x33c   :  { %v970_v52 = vmul.f32 0.5, %v2612_v42 }
 0x33d   :  { %v974_v54 = vmul.f32 0.5, %v2613_v50  ;;  %v979_v60 = vmul.f32 0.5, %v2629_v58 }
 0x33e   :  { %2701 = vtanh.f32 %v970_v52 }
 0x33f   :  { %2703 = vtanh.f32 %v974_v54 }
 0x340   :  { %2705 = vtanh.f32 %v2628_v56 }
 0x341   :  { %2707 = vtanh.f32 %v979_v60 }
 0x348   :  { %v2702_v63 = vpop.eup %2701 }
 0x349   :  { %v2704_v0 = vpop.eup %2703  ;;  %v972_v4 = vadd.f32 1.0, %v2702_v63 }
 0x34a   :  { %v976_v13 = vadd.f32 1.0, %v2704_v0  ;;  %v2706_v21 = vpop.eup %2705 }
 0x34b   :  { %v973_v14 = vmul.f32 0.5, %v972_v4  ;;  %v2708_v38 = vpop.eup %2707 }
 0x34c   :  { %v977_v28 = vmul.f32 0.5, %v976_v13  ;;  %v981_v8 = vadd.f32 1.0, %v2708_v38 }
 0x34d   :  { %v984_v31 = vmul.f32 %v2706_v21, %v973_v14 }
 0x34e   :  { %v983_v33 = vmul.f32 %v977_v28, %v3227_v24  ;;  %v982_v41 = vmul.f32 0.5, %v981_v8 }
 0x350   :  { %v3269_v37 = vadd.f32 %v984_v31, %v983_v33 }
 0x352   :  { %2709 = vtanh.f32 %v3269_v37 }
 0x35c   :  { %v2710_v42 = vpop.eup %2709 }
 0x35d   :  { %v987_v46 = vmul.f32 %v2710_v42, %v982_v41 }
 0x35f   :  { %1058 = vmatmul.mubr.f32.vlgmr.msra.gmra.mrb[6].mxu0 %v987_v46  ;;  %1129 = vmatmul.mubr.f32.vlgmr.msra.gmra.mrb[6].mxu1 %v987_v46 }
 0x360   :  { %2347 = vmatpush1.bf16.msra.mxu0 %v2996_v23  ;;  %2379 = vmatpush1.bf16.msra.mxu1 %v2999_v26 }
 0x361   :  { %2349 = vmatprep.subr.bf16.mxu0 %v3003_v30  ;;  %2381 = vmatprep.subr.bf16.mxu1 %v3007_v35 }
 0x362   :  { %1226 = vmatprep.mubr.f32.mxu0 %v2872_v1  ;;  %1297 = vmatprep.mubr.f32.mxu1 %v2872_v1 }
 0x364   :  { %2351 = vmatpush1.bf16.msra.mxu0 %v3009_v36  ;;  %2383 = vmatpush1.bf16.msra.mxu1 %v3013_v39 }
 0x365   :  { %2353 = vmatprep.subr.bf16.mxu0 %v3017_v43  ;;  %2385 = vmatprep.subr.bf16.mxu1 %v3021_v48 }
 0x368   :  { %2355 = vmatpush1.bf16.msra.mxu0 %v3025_v51  ;;  %2387 = vmatpush1.bf16.msra.mxu1 %v3029_v55 }
 0x369   :  { %2357 = vmatprep.subr.bf16.mxu0 %v3033_v59  ;;  %2389 = vmatprep.subr.bf16.mxu1 %v3037_v62 }
 0x36c   :  { %2359 = vmatpush1.bf16.msra.mxu0 %v3041_v3  ;;  %2391 = vmatpush1.bf16.msra.mxu1 %v3045_v6 }
 0x36d   :  { %2361 = vmatprep.subr.bf16.mxu0 %v3049_v9  ;;  %2393 = vmatprep.subr.bf16.mxu1 %v3053_v12 }
 0x370   :  { %2363 = vmatpush1.bf16.msra.mxu0 %v3057_v16  ;;  %2395 = vmatpush1.bf16.msra.mxu1 %v3061_v20 }
 0x371   :  { %2365 = vmatprep.subr.bf16.mxu0 %v3065_v25  ;;  %2397 = vmatprep.subr.bf16.mxu1 %v3069_v29 }
 0x374   :  { %2367 = vmatpush1.bf16.msra.mxu0 %v3073_v34  ;;  %2399 = vmatpush1.bf16.msra.mxu1 %v3077_v40 }
 0x375   :  { %2369 = vmatprep.subr.bf16.mxu0 %v3081_v44  ;;  %2401 = vmatprep.subr.bf16.mxu1 %v3085_v47 }
 0x378   :  { %2371 = vmatpush1.bf16.msra.mxu0 %v3089_v53  ;;  %2403 = vmatpush1.bf16.msra.mxu1 %v3093_v57 }
 0x379   :  { %2373 = vmatprep.subr.bf16.mxu0 %v3097_v61  ;;  %2405 = vmatprep.subr.bf16.mxu1 %v3101_v2 }
 0x37c   :  { %2375 = vmatpush1.bf16.msra.mxu0 %v3105_v5  ;;  %2407 = vmatpush1.bf16.msra.mxu1 %v3109_v7 }
 0x37d   :  { %2409 = vmatprep.subr.bf16.mxu0 %v2992_v18  ;;  %2441 = vmatprep.subr.bf16.mxu1 %v2994_v22 }
 0x432   :  { %v1059_v24 = vpop.f32.mrb[6].mxu0  ;;  %v1130_v49 = vpop.f32.mrb[6].mxu1 }
 0x433   :  { %v2614_v50 = vadd.f32 %v1059_v24, %v3167_v15  ;;  %v1061_v52 = vpop.f32.mrb[7].mxu0  ;;  %v1132_v54 = vpop.f32.mrb[7].mxu1  ;;  %v2630_v63 = vadd.f32 %v1130_v49, %v3175_v27 }
 0x434   :  { %v2615_v56 = vadd.f32 %v1061_v52, %v3170_v19  ;;  %v2631_v0 = vadd.f32 %v1132_v54, %v3182_v45 }
 0x435   :  { %v1139_v58 = vmul.f32 0.5, %v2614_v50 }
 0x436   :  { %v1143_v60 = vmul.f32 0.5, %v2615_v56  ;;  %v1148_v4 = vmul.f32 0.5, %v2631_v0 }
 0x437   :  { %2711 = vtanh.f32 %v1139_v58 }
 0x438   :  { %2713 = vtanh.f32 %v1143_v60 }
 0x439   :  { %2715 = vtanh.f32 %v2630_v63 }
 0x43a   :  { %2717 = vtanh.f32 %v1148_v4 }
 0x441   :  { %v2712_v13 = vpop.eup %2711 }
 0x442   :  { %v2714_v14 = vpop.eup %2713  ;;  %v1141_v21 = vadd.f32 1.0, %v2712_v13 }
 0x443   :  { %v1145_v28 = vadd.f32 1.0, %v2714_v14  ;;  %v2716_v33 = vpop.eup %2715 }
 0x444   :  { %v1142_v31 = vmul.f32 0.5, %v1141_v21  ;;  %v2718_v46 = vpop.eup %2717 }
 0x445   :  { %v1146_v38 = vmul.f32 0.5, %v1145_v28  ;;  %v1150_v24 = vadd.f32 1.0, %v2718_v46 }
 0x446   :  { %v1153_v8 = vmul.f32 %v2716_v33, %v1142_v31 }
 0x447   :  { %v1152_v41 = vmul.f32 %v1146_v38, %v3269_v37  ;;  %v1151_v49 = vmul.f32 0.5, %v1150_v24 }
 0x449   :  { %v3311_v42 = vadd.f32 %v1153_v8, %v1152_v41 }
 0x44b   :  { %2719 = vtanh.f32 %v3311_v42 }
 0x455   :  { %v2720_v50 = vpop.eup %2719 }
 0x456   :  { %v1156_v52 = vmul.f32 %v2720_v50, %v1151_v49 }
 0x458   :  { %1227 = vmatmul.mubr.f32.vlgmr.msra.gmra.mrb[8].mxu0 %v1156_v52  ;;  %1298 = vmatmul.mubr.f32.vlgmr.msra.gmra.mrb[8].mxu1 %v1156_v52 }
 0x459   :  { %2411 = vmatpush1.bf16.msra.mxu0 %v2996_v23  ;;  %2443 = vmatpush1.bf16.msra.mxu1 %v2999_v26 }
 0x45a   :  { %2413 = vmatprep.subr.bf16.mxu0 %v3003_v30  ;;  %2445 = vmatprep.subr.bf16.mxu1 %v3007_v35 }
 0x45b   :  { %1395 = vmatprep.mubr.f32.mxu0 %v2872_v1  ;;  %1466 = vmatprep.mubr.f32.mxu1 %v2872_v1 }
 0x45d   :  { %2415 = vmatpush1.bf16.msra.mxu0 %v3009_v36  ;;  %2447 = vmatpush1.bf16.msra.mxu1 %v3013_v39 }
 0x45e   :  { %2417 = vmatprep.subr.bf16.mxu0 %v3017_v43  ;;  %2449 = vmatprep.subr.bf16.mxu1 %v3021_v48 }
 0x461   :  { %2419 = vmatpush1.bf16.msra.mxu0 %v3025_v51  ;;  %2451 = vmatpush1.bf16.msra.mxu1 %v3029_v55 }
 0x462   :  { %2421 = vmatprep.subr.bf16.mxu0 %v3033_v59  ;;  %2453 = vmatprep.subr.bf16.mxu1 %v3037_v62 }
 0x465   :  { %2423 = vmatpush1.bf16.msra.mxu0 %v3041_v3  ;;  %2455 = vmatpush1.bf16.msra.mxu1 %v3045_v6 }
 0x466   :  { %2425 = vmatprep.subr.bf16.mxu0 %v3049_v9  ;;  %2457 = vmatprep.subr.bf16.mxu1 %v3053_v12 }
 0x469   :  { %2427 = vmatpush1.bf16.msra.mxu0 %v3057_v16  ;;  %2459 = vmatpush1.bf16.msra.mxu1 %v3061_v20 }
 0x46a   :  { %2429 = vmatprep.subr.bf16.mxu0 %v3065_v25  ;;  %2461 = vmatprep.subr.bf16.mxu1 %v3069_v29 }
 0x46d   :  { %2431 = vmatpush1.bf16.msra.mxu0 %v3073_v34  ;;  %2463 = vmatpush1.bf16.msra.mxu1 %v3077_v40 }
 0x46e   :  { %2433 = vmatprep.subr.bf16.mxu0 %v3081_v44  ;;  %2465 = vmatprep.subr.bf16.mxu1 %v3085_v47 }
 0x471   :  { %2435 = vmatpush1.bf16.msra.mxu0 %v3089_v53  ;;  %2467 = vmatpush1.bf16.msra.mxu1 %v3093_v57 }
 0x472   :  { %2437 = vmatprep.subr.bf16.mxu0 %v3097_v61  ;;  %2469 = vmatprep.subr.bf16.mxu1 %v3101_v2 }
 0x475   :  { %2439 = vmatpush1.bf16.msra.mxu0 %v3105_v5  ;;  %2471 = vmatpush1.bf16.msra.mxu1 %v3109_v7 }
 0x476   :  { %2473 = vmatprep.subr.bf16.mxu0 %v2992_v18  ;;  %2505 = vmatprep.subr.bf16.mxu1 %v2994_v22 }
 0x52b   :  { %v1228_v37 = vpop.f32.mrb[8].mxu0  ;;  %v1299_v54 = vpop.f32.mrb[8].mxu1 }
 0x52c   :  { %v2616_v56 = vadd.f32 %v1228_v37, %v3167_v15  ;;  %v1230_v58 = vpop.f32.mrb[9].mxu0  ;;  %v1301_v60 = vpop.f32.mrb[9].mxu1  ;;  %v2632_v13 = vadd.f32 %v1299_v54, %v3175_v27 }
 0x52d   :  { %v2617_v63 = vadd.f32 %v1230_v58, %v3170_v19  ;;  %v2633_v14 = vadd.f32 %v1301_v60, %v3182_v45 }
 0x52e   :  { %v1308_v0 = vmul.f32 0.5, %v2616_v56 }
 0x52f   :  { %v1312_v4 = vmul.f32 0.5, %v2617_v63  ;;  %v1317_v21 = vmul.f32 0.5, %v2633_v14 }
 0x530   :  { %2721 = vtanh.f32 %v1308_v0 }
 0x531   :  { %2723 = vtanh.f32 %v1312_v4 }
 0x532   :  { %2725 = vtanh.f32 %v2632_v13 }
 0x533   :  { %2727 = vtanh.f32 %v1317_v21 }
 0x53a   :  { %v2722_v28 = vpop.eup %2721 }
 0x53b   :  { %v2724_v31 = vpop.eup %2723  ;;  %v1310_v33 = vadd.f32 1.0, %v2722_v28 }
 0x53c   :  { %v1314_v38 = vadd.f32 1.0, %v2724_v31  ;;  %v2726_v41 = vpop.eup %2725 }
 0x53d   :  { %v1311_v8 = vmul.f32 0.5, %v1310_v33  ;;  %v2728_v52 = vpop.eup %2727 }
 0x53e   :  { %v1315_v46 = vmul.f32 0.5, %v1314_v38  ;;  %v1319_v37 = vadd.f32 1.0, %v2728_v52 }
 0x53f   :  { %v1322_v24 = vmul.f32 %v2726_v41, %v1311_v8 }
 0x540   :  { %v1321_v49 = vmul.f32 %v1315_v46, %v3311_v42  ;;  %v1320_v54 = vmul.f32 0.5, %v1319_v37 }
 0x542   :  { %v3353_v50 = vadd.f32 %v1322_v24, %v1321_v49 }
 0x544   :  { %2729 = vtanh.f32 %v3353_v50 }
 0x54e   :  { %v2730_v56 = vpop.eup %2729 }
 0x54f   :  { %v1325_v58 = vmul.f32 %v2730_v56, %v1320_v54 }
 0x551   :  { %1396 = vmatmul.mubr.f32.vlgmr.msra.gmra.mrb[10].mxu0 %v1325_v58  ;;  %1467 = vmatmul.mubr.f32.vlgmr.msra.gmra.mrb[10].mxu1 %v1325_v58 }
 0x552   :  { %2475 = vmatpush1.bf16.msra.mxu0 %v2996_v23  ;;  %2507 = vmatpush1.bf16.msra.mxu1 %v2999_v26 }
 0x553   :  { %2477 = vmatprep.subr.bf16.mxu0 %v3003_v30  ;;  %2509 = vmatprep.subr.bf16.mxu1 %v3007_v35 }
 0x554   :  { %1564 = vmatprep.mubr.f32.mxu0 %v2872_v1  ;;  %1635 = vmatprep.mubr.f32.mxu1 %v2872_v1 }
 0x556   :  { %2479 = vmatpush1.bf16.msra.mxu0 %v3009_v36  ;;  %2511 = vmatpush1.bf16.msra.mxu1 %v3013_v39 }
 0x557   :  { %2481 = vmatprep.subr.bf16.mxu0 %v3017_v43  ;;  %2513 = vmatprep.subr.bf16.mxu1 %v3021_v48 }
 0x55a   :  { %2483 = vmatpush1.bf16.msra.mxu0 %v3025_v51  ;;  %2515 = vmatpush1.bf16.msra.mxu1 %v3029_v55 }
 0x55b   :  { %2485 = vmatprep.subr.bf16.mxu0 %v3033_v59  ;;  %2517 = vmatprep.subr.bf16.mxu1 %v3037_v62 }
 0x55e   :  { %2487 = vmatpush1.bf16.msra.mxu0 %v3041_v3  ;;  %2519 = vmatpush1.bf16.msra.mxu1 %v3045_v6 }
 0x55f   :  { %2489 = vmatprep.subr.bf16.mxu0 %v3049_v9  ;;  %2521 = vmatprep.subr.bf16.mxu1 %v3053_v12 }
 0x562   :  { %2491 = vmatpush1.bf16.msra.mxu0 %v3057_v16  ;;  %2523 = vmatpush1.bf16.msra.mxu1 %v3061_v20 }
 0x563   :  { %2493 = vmatprep.subr.bf16.mxu0 %v3065_v25  ;;  %2525 = vmatprep.subr.bf16.mxu1 %v3069_v29 }
 0x566   :  { %2495 = vmatpush1.bf16.msra.mxu0 %v3073_v34  ;;  %2527 = vmatpush1.bf16.msra.mxu1 %v3077_v40 }
 0x567   :  { %2497 = vmatprep.subr.bf16.mxu0 %v3081_v44  ;;  %2529 = vmatprep.subr.bf16.mxu1 %v3085_v47 }
 0x56a   :  { %2499 = vmatpush1.bf16.msra.mxu0 %v3089_v53  ;;  %2531 = vmatpush1.bf16.msra.mxu1 %v3093_v57 }
 0x56b   :  { %2501 = vmatprep.subr.bf16.mxu0 %v3097_v61  ;;  %2533 = vmatprep.subr.bf16.mxu1 %v3101_v2 }
 0x56e   :  { %2503 = vmatpush1.bf16.msra.mxu0 %v3105_v5  ;;  %2535 = vmatpush1.bf16.msra.mxu1 %v3109_v7 }
 0x56f   :  { %2537 = vmatprep.subr.bf16.mxu0 %v2992_v18  ;;  %2569 = vmatprep.subr.bf16.mxu1 %v2994_v22 }
 0x624   :  { %v1397_v42 = vpop.f32.mrb[10].mxu0  ;;  %v1468_v60 = vpop.f32.mrb[10].mxu1 }
 0x625   :  { %v2618_v63 = vadd.f32 %v1397_v42, %v3167_v15  ;;  %v1399_v0 = vpop.f32.mrb[11].mxu0  ;;  %v1470_v4 = vpop.f32.mrb[11].mxu1  ;;  %v2634_v28 = vadd.f32 %v1468_v60, %v3175_v27 }
 0x626   :  { %v2619_v13 = vadd.f32 %v1399_v0, %v3170_v19  ;;  %v2635_v31 = vadd.f32 %v1470_v4, %v3182_v45  ;;  %v1846_v0 = vld [vmem:[#allocation10 + $0x30] sm:$0xff] }
 0x627   :  { %v1477_v14 = vmul.f32 0.5, %v2618_v63  ;;  %v1842_v63 = vld [vmem:[#allocation10 + $0x10] sm:$0xff] }
 0x628   :  { %v1481_v21 = vmul.f32 0.5, %v2619_v13  ;;  %v1486_v18 = vmul.f32 0.5, %v2635_v31  ;;  %v2769_v31 = vld [vmem:[#allocation6 + $0x38] sm:$0xff] }
 0x629   :  { %2731 = vtanh.f32 %v1477_v14 }
 0x62a   :  { %2733 = vtanh.f32 %v1481_v21 }
 0x62b   :  { %2735 = vtanh.f32 %v2634_v28  ;;  %v2606_v28 = vpack.c.bf16 %v1846_v0, %v1842_v63 }
 0x62c   :  { %2737 = vtanh.f32 %v1486_v18  ;;  %v1848_v18 = vld [vmem:[%s3469_s4] sm:$0xf] }
 0x633   :  { %v2732_v33 = vpop.eup %2731 }
 0x634   :  { %v2734_v22 = vpop.eup %2733  ;;  %v1479_v38 = vadd.f32 1.0, %v2732_v33 }
 0x635   :  { %v1483_v8 = vadd.f32 1.0, %v2734_v22  ;;  %v2736_v46 = vpop.eup %2735 }
 0x636   :  { %v1480_v41 = vmul.f32 0.5, %v1479_v38  ;;  %v2738_v54 = vpop.eup %2737 }
 0x637   :  { %v1484_v24 = vmul.f32 0.5, %v1483_v8  ;;  %v1488_v56 = vadd.f32 1.0, %v2738_v54 }
 0x638   :  { %v1491_v49 = vmul.f32 %v2736_v46, %v1480_v41  ;;  %v1853_v46 = vrot.slane %v1848_v18, %v115_v11 }
 0x639   :  { %v1490_v52 = vmul.f32 %v1484_v24, %v3353_v50  ;;  %v1489_v58 = vmul.f32 0.5, %v1488_v56  ;;  %v1844_v50 = vld [vmem:[#allocation10 + $0x20] sm:$0xff] }
 0x63b   :  { %v3395_v37 = vadd.f32 %v1491_v49, %v1490_v52  ;;  %v1857_v49 = vrot.slane %v1848_v18, %v123_v17 }
 0x63d   :  { %2739 = vtanh.f32 %v3395_v37 }
 0x647   :  { %v2740_v42 = vpop.eup %2739 }
 0x648   :  { %v1494_v60 = vmul.f32 %v2740_v42, %v1489_v58 }
 0x64a   :  { %1565 = vmatmul.mubr.f32.vlgmr.msra.gmra.mrb[12].mxu0 %v1494_v60  ;;  %1636 = vmatmul.mubr.f32.vlgmr.msra.gmra.mrb[12].mxu1 %v1494_v60 }
 0x64b   :  { %2539 = vmatpush1.bf16.msra.mxu0 %v2996_v23  ;;  %2571 = vmatpush1.bf16.msra.mxu1 %v2999_v26  ;;  %v1841_v23 = vld [vmem:[#allocation10 + $0x8] sm:$0xff] }
 0x64c   :  { %2541 = vmatprep.subr.bf16.mxu0 %v3003_v30  ;;  %2573 = vmatprep.subr.bf16.mxu1 %v3007_v35  ;;  %v1845_v26 = vld [vmem:[#allocation10 + $0x28] sm:$0xff]  ;;  %v1843_v35 = vld [vmem:[#allocation10 + $0x18] sm:$0xff] }
 0x64d   :  { %1733 = vmatprep.mubr.f32.mxu0 %v2872_v1  ;;  %1804 = vmatprep.mubr.f32.mxu1 %v2872_v1  ;;  %v2600_v30 = vpack.c.bf16 %v1845_v26, %v1841_v23 }
 0x64f   :  { %2543 = vmatpush1.bf16.msra.mxu0 %v3009_v36  ;;  %2575 = vmatpush1.bf16.msra.mxu1 %v3013_v39  ;;  %v1847_v36 = vld [vmem:[#allocation10 + $0x38] sm:$0xff] }
 0x650   :  { %2545 = vmatprep.subr.bf16.mxu0 %v3017_v43  ;;  %2577 = vmatprep.subr.bf16.mxu1 %v3021_v48  ;;  %v2604_v39 = vpack.c.bf16 %v1847_v36, %v1843_v35 }
 0x653   :  { %2547 = vmatpush1.bf16.msra.mxu0 %v3025_v51  ;;  %2579 = vmatpush1.bf16.msra.mxu1 %v3029_v55 }
 0x654   :  { %2549 = vmatprep.subr.bf16.mxu0 %v3033_v59  ;;  %2581 = vmatprep.subr.bf16.mxu1 %v3037_v62 }
 0x657   :  { %2551 = vmatpush1.bf16.msra.mxu0 %v3041_v3  ;;  %2583 = vmatpush1.bf16.msra.mxu1 %v3045_v6 }
 0x658   :  { %2553 = vmatprep.subr.bf16.mxu0 %v3049_v9  ;;  %2585 = vmatprep.subr.bf16.mxu1 %v3053_v12 }
 0x65b   :  { %2555 = vmatpush1.bf16.msra.mxu0 %v3057_v16  ;;  %2587 = vmatpush1.bf16.msra.mxu1 %v3061_v20 }
 0x65c   :  { %2557 = vmatprep.subr.bf16.mxu0 %v3065_v25  ;;  %2589 = vmatprep.subr.bf16.mxu1 %v3069_v29 }
 0x65f   :  { %2559 = vmatpush1.bf16.msra.mxu0 %v3073_v34  ;;  %2591 = vmatpush1.bf16.msra.mxu1 %v3077_v40 }
 0x660   :  { %2561 = vmatprep.subr.bf16.mxu0 %v3081_v44  ;;  %2593 = vmatprep.subr.bf16.mxu1 %v3085_v47 }
 0x663   :  { %2563 = vmatpush1.bf16.msra.mxu0 %v3089_v53  ;;  %2595 = vmatpush1.bf16.msra.mxu1 %v3093_v57 }
 0x664   :  { %2565 = vmatprep.subr.bf16.mxu0 %v3097_v61  ;;  %2597 = vmatprep.subr.bf16.mxu1 %v3101_v2 }
 0x667   :  { %2567 = vmatpush1.bf16.msra.mxu0 %v3105_v5  ;;  %2599 = vmatpush1.bf16.msra.mxu1 %v3109_v7  ;;  %v1840_v7 = vld [vmem:[#allocation10] sm:$0xff] }
 0x668   :  { %2601 = vmatprep.subr.bf16.mxu0 %v2600_v30  ;;  %2605 = vmatprep.subr.bf16.mxu1 %v2604_v39  ;;  %v2602_v14 = vpack.c.bf16 %v1844_v50, %v1840_v7  ;;  %v2079_v7 = vld [vmem:[#allocation5] ss:$0 sm:$0xff] }
 0x71d   :  { %v1566_v43 = vpop.f32.mrb[12].mxu0  ;;  %v1637_v48 = vpop.f32.mrb[12].mxu1 }
 0x71e   :  { %v2620_v51 = vadd.f32 %v1566_v43, %v3167_v15  ;;  %v1568_v55 = vpop.f32.mrb[13].mxu0  ;;  %v1639_v59 = vpop.f32.mrb[13].mxu1  ;;  %v2636_v9 = vadd.f32 %v1637_v48, %v3175_v27 }
 0x71f   :  { %v2621_v62 = vadd.f32 %v1568_v55, %v3170_v19  ;;  %v2637_v12 = vadd.f32 %v1639_v59, %v3182_v45 }
 0x720   :  { %v1646_v3 = vmul.f32 0.5, %v2620_v51 }
 0x721   :  { %v1650_v6 = vmul.f32 0.5, %v2621_v62  ;;  %v1655_v16 = vmul.f32 0.5, %v2637_v12 }
 0x722   :  { %2741 = vtanh.f32 %v1646_v3 }
 0x723   :  { %2743 = vtanh.f32 %v1650_v6 }
 0x724   :  { %2745 = vtanh.f32 %v2636_v9 }
 0x725   :  { %2747 = vtanh.f32 %v1655_v16 }
 0x72c   :  { %v2742_v20 = vpop.eup %2741 }
 0x72d   :  { %v2744_v25 = vpop.eup %2743  ;;  %v1648_v29 = vadd.f32 1.0, %v2742_v20 }
 0x72e   :  { %v1652_v34 = vadd.f32 1.0, %v2744_v25  ;;  %v2746_v44 = vpop.eup %2745 }
 0x72f   :  { %v1649_v40 = vmul.f32 0.5, %v1648_v29  ;;  %v2748_v2 = vpop.eup %2747 }
 0x730   :  { %v1653_v47 = vmul.f32 0.5, %v1652_v34  ;;  %v1657_v5 = vadd.f32 1.0, %v2748_v2 }
 0x731   :  { %v1660_v53 = vmul.f32 %v2746_v44, %v1649_v40  ;;  %v2077_v40 = vld [vmem:[%s3471_s6] ss:$0 sm:$0xff] }
 0x732   :  { %v1659_v57 = vmul.f32 %v1653_v47, %v3395_v37  ;;  %v1658_v4 = vmul.f32 0.5, %v1657_v5 }
 0x734   :  { %v3435_v61 = vadd.f32 %v1660_v53, %v1659_v57 }
 0x736   :  { %2749 = vtanh.f32 %v3435_v61 }
 0x740   :  { %v2750_v13 = vpop.eup %2749 }
 0x741   :  { %v1663_v21 = vmul.f32 %v2750_v13, %v1658_v4 }
 0x743   :  { %1734 = vmatmul.mubr.f32.vlgmr.msra.gmra.mrb[14].mxu0 %v1663_v21  ;;  %1805 = vmatmul.mubr.f32.vlgmr.msra.gmra.mrb[14].mxu1 %v1663_v21 }
 0x744   :  { %2603 = vmatpush1.bf16.msra.mxu0 %v2602_v14  ;;  %1932 = vmatprep.mubr.f32.mxu0 %v2872_v1 }
 0x745   :  { %2607 = vmatpush1.bf16.msra.mxu1 %v2606_v28  ;;  %2002 = vmatprep.mubr.f32.mxu1 %v2872_v1 }
 0x747   :  { %2075 = vmatmul.mubr.msk.f32.vlgmr.msra.gmra.mrb[16].mxu0 %vm133_vm0, %v2769_v31 }
 0x748   :  { %2076 = vmatmul.mubr.msk.f32.vlgmr.msra.gmra.mrb[16].mxu1 %vm133_vm0, %v2769_v31 }
 0x816   :  { %v1735_v33 = vpop.f32.mrb[14].mxu0  ;;  %v1806_v22 = vpop.f32.mrb[14].mxu1 }
 0x817   :  { %v2622_v38 = vadd.f32 %v1735_v33, %v3167_v15  ;;  %v1737_v8 = vpop.f32.mrb[15].mxu0  ;;  %v1808_v41 = vpop.f32.mrb[15].mxu1  ;;  %v2638_v52 = vadd.f32 %v1806_v22, %v3175_v27  ;;  %v1861_v15 = vrot.slane %v1848_v18, %v127_v32 }
 0x818   :  { %v2623_v1 = vadd.f32 %v1737_v8, %v3170_v19  ;;  %v2639_v19 = vadd.f32 %v1808_v41, %v3182_v45 }
 0x819   :  { %v1815_v24 = vmul.f32 0.5, %v2622_v38 }
 0x81a   :  { %v1819_v37 = vmul.f32 0.5, %v2623_v1  ;;  %v1934_v54 = vpop.f32.mrb[16].mxu0  ;;  %v1824_v27 = vmul.f32 0.5, %v2639_v19 }
 0x81b   :  { %2751 = vtanh.f32 %v1815_v24  ;;  %v1935_v56 = vadd.f32 %v1934_v54, %v1853_v46  ;;  %v1936_v58 = vpop.f32.mrb[17].mxu0  ;;  %v2004_v42 = vpop.f32.mrb[16].mxu1 }
 0x81c   :  { %2753 = vtanh.f32 %v1819_v37  ;;  %v2006_v60 = vpop.f32.mrb[17].mxu1  ;;  %v2005_v23 = vadd.f32 %v2004_v42, %v1857_v49 }
 0x81d   :  { %v2009_v11 = vmul.f32 0.5, %v1935_v56  ;;  %2755 = vtanh.f32 %v2638_v52  ;;  %v2007_v17 = vadd.f32 %v2006_v60, %v1861_v15 }
 0x81f   :  { %2757 = vtanh.f32 %v2009_v11  ;;  %v2014_v26 = vmul.f32 0.5, %v2007_v17 }
 0x820   :  { %2759 = vtanh.f32 %v2005_v23 }
 0x821   :  { %2761 = vtanh.f32 %v1824_v27 }
 0x822   :  { %2763 = vtanh.f32 %v2014_v26 }
 0x825   :  { %v2752_v30 = vpop.eup %2751 }
 0x826   :  { %v2754_v35 = vpop.eup %2753  ;;  %v1817_v36 = vadd.f32 1.0, %v2752_v30 }
 0x827   :  { %v1821_v39 = vadd.f32 1.0, %v2754_v35  ;;  %v2756_v43 = vpop.eup %2755 }
 0x828   :  { %v1818_v48 = vmul.f32 0.5, %v1817_v36 }
 0x829   :  { %v2758_v10 = vpop.eup %2757  ;;  %v1822_v32 = vmul.f32 0.5, %v1821_v39 }
 0x82a   :  { %v1829_v51 = vmul.f32 %v2756_v43, %v1818_v48  ;;  %v2011_v55 = vadd.f32 1.0, %v2758_v10  ;;  %v2760_v59 = vpop.eup %2759 }
 0x82b   :  { %v1828_v45 = vmul.f32 %v1822_v32, %v3435_v61  ;;  %v2762_v9 = vpop.eup %2761  ;;  %v2078_v61 = vld [vmem:[%s3472_s7] ss:$0 sm:$0xff] }
 0x82c   :  { %v2012_v62 = vmul.f32 0.5, %v2011_v55  ;;  %v2764_v12 = vpop.eup %2763  ;;  %v1826_v16 = vadd.f32 1.0, %v2762_v9 }
 0x82d   :  { %v1830_v3 = vadd.f32 %v1829_v51, %v1828_v45  ;;  %v2016_v20 = vadd.f32 1.0, %v2764_v12 }
 0x82e   :  { %v2018_v6 = vmul.f32 %v2760_v59, %v2012_v62  ;;  %v1827_v25 = vmul.f32 0.5, %v1826_v16 }
 0x82f   :  { %2765 = vtanh.f32 %v1830_v3  ;;  %v2017_v34 = vmul.f32 0.5, %v2016_v20 }
 0x830   :  { %2767 = vtanh.f32 %v2018_v6 }
 0x839   :  { %v2766_v29 = vpop.eup %2765 }
 0x83a   :  { %v2768_v44 = vpop.eup %2767  ;;  %v1832_v47 = vmul.f32 %v2766_v29, %v1827_v25 }
 0x83b   :  { %v2020_v53 = vmul.f32 %v2768_v44, %v2017_v34 }
 0x83c   :  { %v2028_v57 = vmul.f32 %v2077_v40, %v1832_v47 }
 0x83d   :  { %v2038_v2 = vmul.f32 %v2078_v61, %v2020_v53 }
 0x83e   :  { %2029 = vadd.xlane.f32.xlu0 %v2028_v57 }
 0x842   :  { %2039 = vadd.xlane.f32.xlu0 %v2038_v2 }
 0x8cb   :  { %v2030_v5 = vpop.xlane.xlu0 %2029 }
 0x8cf   :  { %v2040_v50 = vpop.xlane.xlu0 %2039 }
 0x8d0   :  { %v2041_v63 = vadd.f32 %v2040_v50, %v2030_v5 }
 0x8d2   :  { %v2049_v0 = vadd.f32 %v2079_v7, %v2041_v63 }
 0x8d4   :  { %2051 = vst.msk [vmem:[%s3474_s9] sm:$0xff] %vm2050_vm1, %v2049_v0 }
 0x8d5   :  { %2056 = vsyncpa [#allocation7], 1 }
 0x8d6   :  { %2057 = vsyncpa [#allocation9], 1 }
 0x8d7   :  { %2058 = vsyncpa [#allocation12], 1 }

</bundles_post_ra>
